<compile_context>
chip_gen: v7x
topology: tpu7x:2x2x1
jax: 0.10.0
libtpu: 0.0.40
codegen_flags: <defaults>
</compile_context>

<pallas_src>
import numpy as np

import jax
import jax.numpy as jnp
from jax.experimental import pallas as pl
from jax.experimental.pallas import tpu as pltpu


# ----------------------------------------------------------------------------
# Architecture constants (assumed MLP_FE configuration).
# ----------------------------------------------------------------------------
H = W = 16                    # input spatial size
CIN = 3                       # input channels (RGB)
C1, C2 = 8, 16                # conv channels
H2, W2 = H // 2, W // 2       # after pool1 -> 8
H3, W3 = H // 4, W // 4       # after pool2 -> 4
HID1, HID2, NCLS = 64, 32, 10
FEAT = C2 * H3 * W3           # 256
OUT_LANES = 128               # lane-dense padded output width
MAX_BATCH_TILE = 128          # images per grid step (cap)


def _round_up(v, m):
    return ((v + m - 1) // m) * m


# ----------------------------------------------------------------------------
# Fused forward kernel: B_TILE images per grid step, everything in VMEM.
# ----------------------------------------------------------------------------
def _fused_kernel(x_ref, a1_ref, b1m_ref, a2_ref, b2m_ref, t1_ref, t2_ref,
                  bf1_ref, fb1_ref, w2_ref, fb2_ref, w3_ref, fb3_ref,
                  o_ref, pad1_ref, q1_ref, pad2_ref, q2_ref):
    f32 = jnp.float32
    bf16 = jnp.bfloat16
    bt = x_ref.shape[0]          # images in this tile
    bh1 = bt * H                 # stacked rows for conv1 / pool1
    bh2 = bt * H2                # stacked rows for conv2 / pool2
    k1 = W * CIN                 # 48
    k2 = W2 * C1                 # 64

    def dotf(a, b):              # bf16 x bf16 -> f32 accumulate on the MXU
        return jnp.dot(a, b, preferred_element_type=f32)

    # ---- conv1 (3x3, pad=1) + ReLU ------------------------------------------
    # Row padding lives in a VMEM scratch; only the boundary rows are zeroed
    # (the interior is fully overwritten each step).  Column padding is folded
    # into the banded a1 matrices.  Each kh tap is one (bt*16,48)x(48,128)
    # matmul with a lane-dense [w*8 + c] output.
    zrow1 = jnp.zeros((bt, 1, k1), f32)
    pad1_ref[:, 0:1, :] = zrow1
    pad1_ref[:, H + 1:H + 2, :] = zrow1
    pad1_ref[:, 1:H + 1, :] = x_ref[...]

    acc1 = dotf(pad1_ref[:, 0:H, :].reshape(bh1, k1).astype(bf16), a1_ref[0])
    acc1 = acc1 + dotf(pad1_ref[:, 1:H + 1, :].reshape(bh1, k1).astype(bf16),
                       a1_ref[1])
    acc1 = acc1 + dotf(pad1_ref[:, 2:H + 2, :].reshape(bh1, k1).astype(bf16),
                       a1_ref[2])
    h1 = jnp.maximum(acc1 + b1m_ref[...], 0.0)           # (bt*16, 128) f32

    # ---- maxpool 2x2 stride 2 ------------------------------------------------
    # Lane direction via one-hot selection matmuls; row direction via strided
    # VMEM reads + elementwise max (no selection matmuls in the row direction).
    h1b = h1.astype(bf16)
    q1_ref[...] = jnp.maximum(dotf(h1b, t1_ref[0]), dotf(h1b, t1_ref[1]))
    p1 = jnp.maximum(q1_ref[pl.ds(0, bh2, 2), :],
                     q1_ref[pl.ds(1, bh2, 2), :])         # (bt*8, 64) f32

    # ---- conv2 (3x3, pad=1) + ReLU on the VMEM-resident pooled map ----------
    zrow2 = jnp.zeros((bt, 1, k2), f32)
    pad2_ref[:, 0:1, :] = zrow2
    pad2_ref[:, H2 + 1:H2 + 2, :] = zrow2
    pad2_ref[:, 1:H2 + 1, :] = p1.reshape(bt, H2, k2)

    acc2 = dotf(pad2_ref[:, 0:H2, :].reshape(bh2, k2).astype(bf16), a2_ref[0])
    acc2 = acc2 + dotf(pad2_ref[:, 1:H2 + 1, :].reshape(bh2, k2).astype(bf16),
                       a2_ref[1])
    acc2 = acc2 + dotf(pad2_ref[:, 2:H2 + 2, :].reshape(bh2, k2).astype(bf16),
                       a2_ref[2])
    h2 = jnp.maximum(acc2 + b2m_ref[...], 0.0)            # (bt*8, 128) f32

    # ---- maxpool 2x2 (lane direction now; row direction folded into FC1) ----
    h2b = h2.astype(bf16)
    q2_ref[...] = jnp.maximum(dotf(h2b, t2_ref[0]), dotf(h2b, t2_ref[1]))

    # ---- pool2 rows + PyTorch (C,H,W) flatten + fused 3-layer MLP -----------
    # FC1 is applied per pooled row i with the flatten order folded into bf1;
    # the per-image row gather is a stride-8 VMEM read, so M = bt everywhere.
    accf = None
    for i in range(H3):
        e = q2_ref[pl.ds(2 * i, bt, H2), :]               # (bt, 64)
        o = q2_ref[pl.ds(2 * i + 1, bt, H2), :]
        m = jnp.maximum(e, o).astype(bf16)                # row-direction pool
        term = dotf(m, bf1_ref[i])                        # (bt, 64)
        accf = term if accf is None else accf + term
    z = jnp.maximum(accf + fb1_ref[...], 0.0)             # (bt, 64)
    z = jnp.maximum(dotf(z.astype(bf16), w2_ref[...]) + fb2_ref[...], 0.0)
    z = dotf(z.astype(bf16), w3_ref[...]) + fb3_ref[...]  # (bt, 128) lane-dense
    o_ref[...] = z.astype(o_ref.dtype)


# ----------------------------------------------------------------------------
# One-time parameter preparation (all layout plumbing folded into constants).
# ----------------------------------------------------------------------------
def prepare_kernel_params(params):
    """Convert PyTorch-layout parameters into the fused kernel's operands.

    The NCHW flatten order, nn.Linear (out,in) transposition, the conv taps as
    banded matmuls over merged (w, c) lane axes and the lane-direction 2x2
    max-pool selectors are all folded into constants here; matmul operands are
    stored as bf16 (biases stay f32 for the f32 accumulators).
    """
    w1 = np.asarray(params["conv1_w"], np.float32)   # (C1, CIN, 3, 3)
    b1 = np.asarray(params["conv1_b"], np.float32)
    w2 = np.asarray(params["conv2_w"], np.float32)   # (C2, C1, 3, 3)
    b2 = np.asarray(params["conv2_b"], np.float32)
    f1w = np.asarray(params["fc1_w"], np.float32)    # (HID1, FEAT)
    f1b = np.asarray(params["fc1_b"], np.float32)
    f2w = np.asarray(params["fc2_w"], np.float32)    # (HID2, HID1)
    f2b = np.asarray(params["fc2_b"], np.float32)
    f3w = np.asarray(params["fc3_w"], np.float32)    # (NCLS, HID2)
    f3b = np.asarray(params["fc3_b"], np.float32)

    # conv1 banded taps over the merged (w_in, c_in) lane axis -> (w_out, c_out).
    a1 = np.zeros((3, W * CIN, W * C1), np.float32)
    for kh in range(3):
        for wi in range(W):
            for wo in range(W):
                kw = wi - wo + 1
                if 0 <= kw < 3:
                    for ci in range(CIN):
                        a1[kh, wi * CIN + ci, wo * C1:(wo + 1) * C1] = w1[:, ci, kh, kw]
    b1m = np.tile(b1, W).reshape(1, W * C1)                      # (1, 128)

    # conv2 banded taps over the merged (w_in, c_in) lane axis (C1 channels).
    a2 = np.zeros((3, W2 * C1, W2 * C2), np.float32)
    for kh in range(3):
        for wi in range(W2):
            for wo in range(W2):
                kw = wi - wo + 1
                if 0 <= kw < 3:
                    a2[kh, wi * C1:(wi + 1) * C1,
                       wo * C2:(wo + 1) * C2] = w2[:, :, kh, kw].T
    b2m = np.tile(b2, W2).reshape(1, W2 * C2)                    # (1, 128)

    # Lane-direction 2x2 max-pool selectors (even / odd column of each pair).
    def lane_pool(width, ch):
        t = np.zeros((2, width * ch, (width // 2) * ch), np.float32)
        for par in (0, 1):
            for wo in range(width // 2):
                for c in range(ch):
                    t[par, (2 * wo + par) * ch + c, wo * ch + c] = 1.0
        return t

    t1 = lane_pool(W, C1)       # (2, 128, 64)
    t2 = lane_pool(W2, C2)      # (2, 128, 64)

    # fc1: fold PyTorch's (C, H, W) flatten order and (out, in) weight layout
    # into per-row weight blocks applied to the (w*C2 + c) pooled lanes.
    bf1 = np.zeros((H3, W3 * C2, HID1), np.float32)
    for i in range(H3):
        for j in range(W3):
            for c in range(C2):
                bf1[i, j * C2 + c, :] = f1w[:, c * (H3 * W3) + i * W3 + j]

    # fc3 padded to a lane-dense 128-wide output slab.
    w3p = np.zeros((HID2, OUT_LANES), np.float32)
    w3p[:, :NCLS] = f3w.T
    fb3p = np.zeros((1, OUT_LANES), np.float32)
    fb3p[0, :NCLS] = f3b

    bf = jnp.bfloat16
    return (jnp.asarray(a1, bf), jnp.asarray(b1m),
            jnp.asarray(a2, bf), jnp.asarray(b2m),
            jnp.asarray(t1, bf), jnp.asarray(t2, bf),
            jnp.asarray(bf1, bf), jnp.asarray(f1b.reshape(1, -1)),
            jnp.asarray(np.ascontiguousarray(f2w.T), bf),
            jnp.asarray(f2b.reshape(1, -1)),
            jnp.asarray(w3p, bf), jnp.asarray(fb3p))


# ----------------------------------------------------------------------------
# Full MLP_FE forward: a single pallas_call, raw NCHW in, (N, 10) out.
# ----------------------------------------------------------------------------
def mlp_fe_forward(x_nchw, kernel_ops):
    (a1, b1m, a2, b2m, t1, t2, bf1, fb1, w2k, fb2, w3k, fb3) = kernel_ops
    n = x_nchw.shape[0]
    bt = int(min(MAX_BATCH_TILE, _round_up(n, 8)))       # images per grid step
    n_pad = _round_up(n, bt)

    # Single cheap wrapper transpose: (N,C,H,W) -> (N,H,W*CIN) so conv1's lane
    # axis is the merged (w, c) axis and the per-step input DMA is one big
    # contiguous (bt, 16, 48) block.
    x = jnp.transpose(x_nchw, (0, 2, 3, 1)).reshape(n, H, W * CIN)
    if n_pad != n:
        x = jnp.pad(x, ((0, n_pad - n), (0, 0), (0, 0)))

    def c2(i):
        return (0, 0)

    def c3(i):
        return (0, 0, 0)

    out = pl.pallas_call(
        _fused_kernel,
        out_shape=jax.ShapeDtypeStruct((n_pad, OUT_LANES), jnp.float32),
        grid=(n_pad // bt,),
        in_specs=[
            pl.BlockSpec((bt, H, W * CIN), lambda i: (i, 0, 0)),
            pl.BlockSpec(a1.shape, c3),
            pl.BlockSpec(b1m.shape, c2),
            pl.BlockSpec(a2.shape, c3),
            pl.BlockSpec(b2m.shape, c2),
            pl.BlockSpec(t1.shape, c3),
            pl.BlockSpec(t2.shape, c3),
            pl.BlockSpec(bf1.shape, c3),
            pl.BlockSpec(fb1.shape, c2),
            pl.BlockSpec(w2k.shape, c2),
            pl.BlockSpec(fb2.shape, c2),
            pl.BlockSpec(w3k.shape, c2),
            pl.BlockSpec(fb3.shape, c2),
        ],
        out_specs=pl.BlockSpec((bt, OUT_LANES), lambda i: (i, 0)),
        scratch_shapes=[
            pltpu.VMEM((bt, H + 2, W * CIN), jnp.float32),    # padded conv1 input
            pltpu.VMEM((bt * H, W2 * C1), jnp.float32),       # lane-pooled conv1
            pltpu.VMEM((bt, H2 + 2, W2 * C1), jnp.float32),   # padded conv2 input
            pltpu.VMEM((bt * H2, W3 * C2), jnp.float32),      # lane-pooled conv2
        ],
        compiler_params=pltpu.CompilerParams(
            dimension_semantics=("parallel",)),
    )(x, a1, b1m, a2, b2m, t1, t2, bf1, fb1, w2k, fb2, w3k, fb3)
    return out[:n, :NCLS]


# ----------------------------------------------------------------------------
# PyTorch-layout parameter init and a plain-JAX reference for verification.
# ----------------------------------------------------------------------------
def init_params(key):
    ks = jax.random.split(key, 10)

    def scaled(k, shape, fan_in):
        return jax.random.normal(k, shape, jnp.float32) / jnp.sqrt(fan_in)

    return {
        "conv1_w": scaled(ks[0], (C1, CIN, 3, 3), 9 * CIN),
        "conv1_b": 0.1 * jax.random.normal(ks[1], (C1,), jnp.float32),
        "conv2_w": scaled(ks[2], (C2, C1, 3, 3), 9 * C1),
        "conv2_b": 0.1 * jax.random.normal(ks[3], (C2,), jnp.float32),
        "fc1_w": scaled(ks[4], (HID1, FEAT), FEAT),
        "fc1_b": 0.1 * jax.random.normal(ks[5], (HID1,), jnp.float32),
        "fc2_w": scaled(ks[6], (HID2, HID1), HID1),
        "fc2_b": 0.1 * jax.random.normal(ks[7], (HID2,), jnp.float32),
        "fc3_w": scaled(ks[8], (NCLS, HID2), HID2),
        "fc3_b": 0.1 * jax.random.normal(ks[9], (NCLS,), jnp.float32),
    }


def reference_forward(x_nchw, params):
    hi = jax.lax.Precision.HIGHEST
    y = jax.lax.conv_general_dilated(
        x_nchw, params["conv1_w"], (1, 1), "SAME",
        dimension_numbers=("NCHW", "OIHW", "NCHW"), precision=hi)
    y = jax.nn.relu(y + params["conv1_b"][None, :, None, None])
    n, c, hh, ww = y.shape
    y = y.reshape(n, c, hh // 2, 2, ww // 2, 2).max(axis=(3, 5))
    y = jax.lax.conv_general_dilated(
        y, params["conv2_w"], (1, 1), "SAME",
        dimension_numbers=("NCHW", "OIHW", "NCHW"), precision=hi)
    y = jax.nn.relu(y + params["conv2_b"][None, :, None, None])
    n, c, hh, ww = y.shape
    y = y.reshape(n, c, hh // 2, 2, ww // 2, 2).max(axis=(3, 5))
    f = y.reshape(n, -1)                                  # (C,H,W) flatten order
    z = jax.nn.relu(jnp.matmul(f, params["fc1_w"].T, precision=hi) + params["fc1_b"])
    z = jax.nn.relu(jnp.matmul(z, params["fc2_w"].T, precision=hi) + params["fc2_b"])
    return jnp.matmul(z, params["fc3_w"].T, precision=hi) + params["fc3_b"]


if __name__ == "__main__":
    key = jax.random.PRNGKey(0)
    k_x, k_p = jax.random.split(key)

    # Small RGB batch, PyTorch NCHW convention.
    x = jax.random.normal(k_x, (2, CIN, H, W), jnp.float32)
    params = init_params(k_p)
    ops = prepare_kernel_params(params)

    fwd = jax.jit(mlp_fe_forward)
    out = jax.block_until_ready(fwd(x, ops))

    ref = jax.block_until_ready(reference_forward(x, params))

    assert out.shape == (2, NCLS)
    assert bool(jnp.all(jnp.isfinite(out)))
    # Tolerance covers bf16 MXU operands (f32 accumulation) vs. the f32
    # HIGHEST-precision reference; observed error is ~1e-2 worst-case.
    err = float(jnp.max(jnp.abs(out - ref)))
    assert bool(jnp.allclose(out, ref, atol=6e-2, rtol=6e-2)), (
        "max abs diff vs reference: %f" % err)
    print("KERNEL_OK")
</pallas_src>

<mosaic_0001>
module attributes {stable_mosaic.version = 11 : i64} {
  func.func @_fused_kernel(%arg0: i32, %arg1: memref<8x16x48xf32, #tpu.memory_space<vmem>>, %arg2: memref<3x48x128xbf16, #tpu.memory_space<vmem>>, %arg3: memref<1x128xf32, #tpu.memory_space<vmem>>, %arg4: memref<3x64x128xbf16, #tpu.memory_space<vmem>>, %arg5: memref<1x128xf32, #tpu.memory_space<vmem>>, %arg6: memref<2x128x64xbf16, #tpu.memory_space<vmem>>, %arg7: memref<2x128x64xbf16, #tpu.memory_space<vmem>>, %arg8: memref<4x64x64xbf16, #tpu.memory_space<vmem>>, %arg9: memref<1x64xf32, #tpu.memory_space<vmem>>, %arg10: memref<64x32xbf16, #tpu.memory_space<vmem>>, %arg11: memref<1x32xf32, #tpu.memory_space<vmem>>, %arg12: memref<32x128xbf16, #tpu.memory_space<vmem>>, %arg13: memref<1x128xf32, #tpu.memory_space<vmem>>, %arg14: memref<8x128xf32, #tpu.memory_space<vmem>>, %arg15: memref<8x18x48xf32, #tpu.memory_space<vmem>>, %arg16: memref<128x64xf32, #tpu.memory_space<vmem>>, %arg17: memref<8x10x64xf32, #tpu.memory_space<vmem>>, %arg18: memref<64x64xf32, #tpu.memory_space<vmem>>) attributes {dimension_semantics = [#tpu.dimension_semantics<parallel>], iteration_bounds = array<i64: 1>, scalar_prefetch = 0 : i64, scratch_operands = 4 : i64, tpu.core_type = #tpu.core_type<tc>, window_params = [{transform_indices = @transform_0, window_bounds = array<i64: 8, 16, 48>}, {pipeline_mode = #tpu.pipeline_mode<synchronous>, transform_indices = @transform_1, window_bounds = array<i64: 3, 48, 128>}, {pipeline_mode = #tpu.pipeline_mode<synchronous>, transform_indices = @transform_2, window_bounds = array<i64: 1, 128>}, {pipeline_mode = #tpu.pipeline_mode<synchronous>, transform_indices = @transform_3, window_bounds = array<i64: 3, 64, 128>}, {pipeline_mode = #tpu.pipeline_mode<synchronous>, transform_indices = @transform_4, window_bounds = array<i64: 1, 128>}, {pipeline_mode = #tpu.pipeline_mode<synchronous>, transform_indices = @transform_5, window_bounds = array<i64: 2, 128, 64>}, {pipeline_mode = #tpu.pipeline_mode<synchronous>, transform_indices = @transform_6, window_bounds = array<i64: 2, 128, 64>}, {pipeline_mode = #tpu.pipeline_mode<synchronous>, transform_indices = @transform_7, window_bounds = array<i64: 4, 64, 64>}, {pipeline_mode = #tpu.pipeline_mode<synchronous>, transform_indices = @transform_8, window_bounds = array<i64: 1, 64>}, {pipeline_mode = #tpu.pipeline_mode<synchronous>, transform_indices = @transform_9, window_bounds = array<i64: 64, 32>}, {pipeline_mode = #tpu.pipeline_mode<synchronous>, transform_indices = @transform_10, window_bounds = array<i64: 1, 32>}, {pipeline_mode = #tpu.pipeline_mode<synchronous>, transform_indices = @transform_11, window_bounds = array<i64: 32, 128>}, {pipeline_mode = #tpu.pipeline_mode<synchronous>, transform_indices = @transform_12, window_bounds = array<i64: 1, 128>}, {transform_indices = @transform_13, window_bounds = array<i64: 8, 128>}]} {
    %cst = arith.constant 0.000000e+00 : f32
    %0 = vector.broadcast %cst : f32 to vector<8x1x48xf32>
    %c0 = arith.constant 0 : index
    %c0_0 = arith.constant 0 : index
    %c0_1 = arith.constant 0 : index
    %1 = vector.load %arg15[%c0, %c0_0, %c0_1] : memref<8x18x48xf32, #tpu.memory_space<vmem>>, vector<8x1x48xf32>
    tpu.vector_store %arg15[%c0, %c0_0, %c0_1], %0 {strides = array<i32>} : memref<8x18x48xf32, #tpu.memory_space<vmem>>, vector<8x1x48xf32>,
    %c0_2 = arith.constant 0 : index
    %c17 = arith.constant 17 : index
    %c0_3 = arith.constant 0 : index
    %2 = vector.load %arg15[%c0_2, %c17, %c0_3] : memref<8x18x48xf32, #tpu.memory_space<vmem>>, vector<8x1x48xf32>
    tpu.vector_store %arg15[%c0_2, %c17, %c0_3], %0 {strides = array<i32>} : memref<8x18x48xf32, #tpu.memory_space<vmem>>, vector<8x1x48xf32>,
    %c0_4 = arith.constant 0 : index
    %c0_5 = arith.constant 0 : index
    %c0_6 = arith.constant 0 : index
    %3 = vector.load %arg1[%c0_4, %c0_5, %c0_6] : memref<8x16x48xf32, #tpu.memory_space<vmem>>, vector<8x16x48xf32>
    %c0_7 = arith.constant 0 : index
    %c1 = arith.constant 1 : index
    %c0_8 = arith.constant 0 : index
    %4 = vector.load %arg15[%c0_7, %c1, %c0_8] : memref<8x18x48xf32, #tpu.memory_space<vmem>>, vector<8x16x48xf32>
    tpu.vector_store %arg15[%c0_7, %c1, %c0_8], %3 {strides = array<i32>} : memref<8x18x48xf32, #tpu.memory_space<vmem>>, vector<8x16x48xf32>,
    %c0_9 = arith.constant 0 : index
    %c0_10 = arith.constant 0 : index
    %c0_11 = arith.constant 0 : index
    %5 = vector.load %arg15[%c0_9, %c0_10, %c0_11] : memref<8x18x48xf32, #tpu.memory_space<vmem>>, vector<8x16x48xf32>
    %6 = vector.shape_cast %5 : vector<8x16x48xf32> to vector<128x48xf32>
    %7 = arith.truncf %6 : vector<128x48xf32> to vector<128x48xbf16>
    %c0_12 = arith.constant 0 : index
    %c0_13 = arith.constant 0 : index
    %c0_14 = arith.constant 0 : index
    %8 = vector.load %arg2[%c0_12, %c0_13, %c0_14] : memref<3x48x128xbf16, #tpu.memory_space<vmem>>, vector<1x48x128xbf16>
    %9 = vector.shape_cast %8 : vector<1x48x128xbf16> to vector<48x128xbf16>
    %cst_15 = arith.constant dense<0.000000e+00> : vector<128x128xf32>
    %10 = tpu.matmul %7, %9, %cst_15 {dimension_numbers = #tpu.dot_dimension_numbers<[1], [0], [0], [1], [0, 0, 1, 1], [], []>} : vector<128x48xbf16>, vector<48x128xbf16>, vector<128x128xf32> -> vector<128x128xf32>
    %c0_16 = arith.constant 0 : index
    %c1_17 = arith.constant 1 : index
    %c0_18 = arith.constant 0 : index
    %11 = vector.load %arg15[%c0_16, %c1_17, %c0_18] : memref<8x18x48xf32, #tpu.memory_space<vmem>>, vector<8x16x48xf32>
    %12 = vector.shape_cast %11 : vector<8x16x48xf32> to vector<128x48xf32>
    %13 = arith.truncf %12 : vector<128x48xf32> to vector<128x48xbf16>
    %c1_19 = arith.constant 1 : index
    %c0_20 = arith.constant 0 : index
    %c0_21 = arith.constant 0 : index
    %14 = vector.load %arg2[%c1_19, %c0_20, %c0_21] : memref<3x48x128xbf16, #tpu.memory_space<vmem>>, vector<1x48x128xbf16>
    %15 = vector.shape_cast %14 : vector<1x48x128xbf16> to vector<48x128xbf16>
    %cst_22 = arith.constant dense<0.000000e+00> : vector<128x128xf32>
    %16 = tpu.matmul %13, %15, %cst_22 {dimension_numbers = #tpu.dot_dimension_numbers<[1], [0], [0], [1], [0, 0, 1, 1], [], []>} : vector<128x48xbf16>, vector<48x128xbf16>, vector<128x128xf32> -> vector<128x128xf32>
    %17 = arith.addf %10, %16 : vector<128x128xf32>
    %c0_23 = arith.constant 0 : index
    %c2 = arith.constant 2 : index
    %c0_24 = arith.constant 0 : index
    %18 = vector.load %arg15[%c0_23, %c2, %c0_24] : memref<8x18x48xf32, #tpu.memory_space<vmem>>, vector<8x16x48xf32>
    %19 = vector.shape_cast %18 : vector<8x16x48xf32> to vector<128x48xf32>
    %20 = arith.truncf %19 : vector<128x48xf32> to vector<128x48xbf16>
    %c2_25 = arith.constant 2 : index
    %c0_26 = arith.constant 0 : index
    %c0_27 = arith.constant 0 : index
    %21 = vector.load %arg2[%c2_25, %c0_26, %c0_27] : memref<3x48x128xbf16, #tpu.memory_space<vmem>>, vector<1x48x128xbf16>
    %22 = vector.shape_cast %21 : vector<1x48x128xbf16> to vector<48x128xbf16>
    %cst_28 = arith.constant dense<0.000000e+00> : vector<128x128xf32>
    %23 = tpu.matmul %20, %22, %cst_28 {dimension_numbers = #tpu.dot_dimension_numbers<[1], [0], [0], [1], [0, 0, 1, 1], [], []>} : vector<128x48xbf16>, vector<48x128xbf16>, vector<128x128xf32> -> vector<128x128xf32>
    %24 = arith.addf %17, %23 : vector<128x128xf32>
    %c0_29 = arith.constant 0 : index
    %c0_30 = arith.constant 0 : index
    %25 = vector.load %arg3[%c0_29, %c0_30] : memref<1x128xf32, #tpu.memory_space<vmem>>, vector<1x128xf32>
    %26 = vector.broadcast %25 : vector<1x128xf32> to vector<128x128xf32>
    %27 = arith.addf %24, %26 : vector<128x128xf32>
    %cst_31 = arith.constant 0.000000e+00 : f32
    %28 = vector.broadcast %cst_31 : f32 to vector<128x128xf32>
    %29 = arith.maximumf %27, %28 : vector<128x128xf32>
    %30 = arith.truncf %29 : vector<128x128xf32> to vector<128x128xbf16>
    %c0_32 = arith.constant 0 : index
    %c0_33 = arith.constant 0 : index
    %c0_34 = arith.constant 0 : index
    %31 = vector.load %arg6[%c0_32, %c0_33, %c0_34] : memref<2x128x64xbf16, #tpu.memory_space<vmem>>, vector<1x128x64xbf16>
    %32 = vector.shape_cast %31 : vector<1x128x64xbf16> to vector<128x64xbf16>
    %cst_35 = arith.constant dense<0.000000e+00> : vector<128x64xf32>
    %33 = tpu.matmul %30, %32, %cst_35 {dimension_numbers = #tpu.dot_dimension_numbers<[1], [0], [0], [1], [0, 0, 1, 1], [], []>} : vector<128x128xbf16>, vector<128x64xbf16>, vector<128x64xf32> -> vector<128x64xf32>
    %c1_36 = arith.constant 1 : index
    %c0_37 = arith.constant 0 : index
    %c0_38 = arith.constant 0 : index
    %34 = vector.load %arg6[%c1_36, %c0_37, %c0_38] : memref<2x128x64xbf16, #tpu.memory_space<vmem>>, vector<1x128x64xbf16>
    %35 = vector.shape_cast %34 : vector<1x128x64xbf16> to vector<128x64xbf16>
    %cst_39 = arith.constant dense<0.000000e+00> : vector<128x64xf32>
    %36 = tpu.matmul %30, %35, %cst_39 {dimension_numbers = #tpu.dot_dimension_numbers<[1], [0], [0], [1], [0, 0, 1, 1], [], []>} : vector<128x128xbf16>, vector<128x64xbf16>, vector<128x64xf32> -> vector<128x64xf32>
    %37 = arith.maximumf %33, %36 : vector<128x64xf32>
    %c0_40 = arith.constant 0 : index
    %c0_41 = arith.constant 0 : index
    %38 = vector.load %arg16[%c0_40, %c0_41] : memref<128x64xf32, #tpu.memory_space<vmem>>, vector<128x64xf32>
    tpu.vector_store %arg16[%c0_40, %c0_41], %37 {strides = array<i32>} : memref<128x64xf32, #tpu.memory_space<vmem>>, vector<128x64xf32>,
    %c0_42 = arith.constant 0 : index
    %c0_43 = arith.constant 0 : index
    %39 = tpu.strided_load %arg16[%c0_42, %c0_43] {strides = array<i32: 2, 1>} : memref<128x64xf32, #tpu.memory_space<vmem>>, vector<64x64xf32>
    %c1_44 = arith.constant 1 : index
    %c0_45 = arith.constant 0 : index
    %40 = tpu.strided_load %arg16[%c1_44, %c0_45] {strides = array<i32: 2, 1>} : memref<128x64xf32, #tpu.memory_space<vmem>>, vector<64x64xf32>
    %41 = arith.maximumf %39, %40 : vector<64x64xf32>
    %cst_46 = arith.constant 0.000000e+00 : f32
    %42 = vector.broadcast %cst_46 : f32 to vector<8x1x64xf32>
    %c0_47 = arith.constant 0 : index
    %c0_48 = arith.constant 0 : index
    %c0_49 = arith.constant 0 : index
    %43 = vector.load %arg17[%c0_47, %c0_48, %c0_49] : memref<8x10x64xf32, #tpu.memory_space<vmem>>, vector<8x1x64xf32>
    tpu.vector_store %arg17[%c0_47, %c0_48, %c0_49], %42 {strides = array<i32>} : memref<8x10x64xf32, #tpu.memory_space<vmem>>, vector<8x1x64xf32>,
    %c0_50 = arith.constant 0 : index
    %c9 = arith.constant 9 : index
    %c0_51 = arith.constant 0 : index
    %44 = vector.load %arg17[%c0_50, %c9, %c0_51] : memref<8x10x64xf32, #tpu.memory_space<vmem>>, vector<8x1x64xf32>
    tpu.vector_store %arg17[%c0_50, %c9, %c0_51], %42 {strides = array<i32>} : memref<8x10x64xf32, #tpu.memory_space<vmem>>, vector<8x1x64xf32>,
    %45 = vector.shape_cast %41 : vector<64x64xf32> to vector<8x8x64xf32>
    %c0_52 = arith.constant 0 : index
    %c1_53 = arith.constant 1 : index
    %c0_54 = arith.constant 0 : index
    %46 = vector.load %arg17[%c0_52, %c1_53, %c0_54] : memref<8x10x64xf32, #tpu.memory_space<vmem>>, vector<8x8x64xf32>
    tpu.vector_store %arg17[%c0_52, %c1_53, %c0_54], %45 {strides = array<i32>} : memref<8x10x64xf32, #tpu.memory_space<vmem>>, vector<8x8x64xf32>,
    %c0_55 = arith.constant 0 : index
    %c0_56 = arith.constant 0 : index
    %c0_57 = arith.constant 0 : index
    %47 = vector.load %arg17[%c0_55, %c0_56, %c0_57] : memref<8x10x64xf32, #tpu.memory_space<vmem>>, vector<8x8x64xf32>
    %48 = vector.shape_cast %47 : vector<8x8x64xf32> to vector<64x64xf32>
    %49 = arith.truncf %48 : vector<64x64xf32> to vector<64x64xbf16>
    %c0_58 = arith.constant 0 : index
    %c0_59 = arith.constant 0 : index
    %c0_60 = arith.constant 0 : index
    %50 = vector.load %arg4[%c0_58, %c0_59, %c0_60] : memref<3x64x128xbf16, #tpu.memory_space<vmem>>, vector<1x64x128xbf16>
    %51 = vector.shape_cast %50 : vector<1x64x128xbf16> to vector<64x128xbf16>
    %cst_61 = arith.constant dense<0.000000e+00> : vector<64x128xf32>
    %52 = tpu.matmul %49, %51, %cst_61 {dimension_numbers = #tpu.dot_dimension_numbers<[1], [0], [0], [1], [0, 0, 1, 1], [], []>} : vector<64x64xbf16>, vector<64x128xbf16>, vector<64x128xf32> -> vector<64x128xf32>
    %c0_62 = arith.constant 0 : index
    %c1_63 = arith.constant 1 : index
    %c0_64 = arith.constant 0 : index
    %53 = vector.load %arg17[%c0_62, %c1_63, %c0_64] : memref<8x10x64xf32, #tpu.memory_space<vmem>>, vector<8x8x64xf32>
    %54 = vector.shape_cast %53 : vector<8x8x64xf32> to vector<64x64xf32>
    %55 = arith.truncf %54 : vector<64x64xf32> to vector<64x64xbf16>
    %c1_65 = arith.constant 1 : index
    %c0_66 = arith.constant 0 : index
    %c0_67 = arith.constant 0 : index
    %56 = vector.load %arg4[%c1_65, %c0_66, %c0_67] : memref<3x64x128xbf16, #tpu.memory_space<vmem>>, vector<1x64x128xbf16>
    %57 = vector.shape_cast %56 : vector<1x64x128xbf16> to vector<64x128xbf16>
    %cst_68 = arith.constant dense<0.000000e+00> : vector<64x128xf32>
    %58 = tpu.matmul %55, %57, %cst_68 {dimension_numbers = #tpu.dot_dimension_numbers<[1], [0], [0], [1], [0, 0, 1, 1], [], []>} : vector<64x64xbf16>, vector<64x128xbf16>, vector<64x128xf32> -> vector<64x128xf32>
    %59 = arith.addf %52, %58 : vector<64x128xf32>
    %c0_69 = arith.constant 0 : index
    %c2_70 = arith.constant 2 : index
    %c0_71 = arith.constant 0 : index
    %60 = vector.load %arg17[%c0_69, %c2_70, %c0_71] : memref<8x10x64xf32, #tpu.memory_space<vmem>>, vector<8x8x64xf32>
    %61 = vector.shape_cast %60 : vector<8x8x64xf32> to vector<64x64xf32>
    %62 = arith.truncf %61 : vector<64x64xf32> to vector<64x64xbf16>
    %c2_72 = arith.constant 2 : index
    %c0_73 = arith.constant 0 : index
    %c0_74 = arith.constant 0 : index
    %63 = vector.load %arg4[%c2_72, %c0_73, %c0_74] : memref<3x64x128xbf16, #tpu.memory_space<vmem>>, vector<1x64x128xbf16>
    %64 = vector.shape_cast %63 : vector<1x64x128xbf16> to vector<64x128xbf16>
    %cst_75 = arith.constant dense<0.000000e+00> : vector<64x128xf32>
    %65 = tpu.matmul %62, %64, %cst_75 {dimension_numbers = #tpu.dot_dimension_numbers<[1], [0], [0], [1], [0, 0, 1, 1], [], []>} : vector<64x64xbf16>, vector<64x128xbf16>, vector<64x128xf32> -> vector<64x128xf32>
    %66 = arith.addf %59, %65 : vector<64x128xf32>
    %c0_76 = arith.constant 0 : index
    %c0_77 = arith.constant 0 : index
    %67 = vector.load %arg5[%c0_76, %c0_77] : memref<1x128xf32, #tpu.memory_space<vmem>>, vector<1x128xf32>
    %68 = vector.broadcast %67 : vector<1x128xf32> to vector<64x128xf32>
    %69 = arith.addf %66, %68 : vector<64x128xf32>
    %cst_78 = arith.constant 0.000000e+00 : f32
    %70 = vector.broadcast %cst_78 : f32 to vector<64x128xf32>
    %71 = arith.maximumf %69, %70 : vector<64x128xf32>
    %72 = arith.truncf %71 : vector<64x128xf32> to vector<64x128xbf16>
    %c0_79 = arith.constant 0 : index
    %c0_80 = arith.constant 0 : index
    %c0_81 = arith.constant 0 : index
    %73 = vector.load %arg7[%c0_79, %c0_80, %c0_81] : memref<2x128x64xbf16, #tpu.memory_space<vmem>>, vector<1x128x64xbf16>
    %74 = vector.shape_cast %73 : vector<1x128x64xbf16> to vector<128x64xbf16>
    %cst_82 = arith.constant dense<0.000000e+00> : vector<64x64xf32>
    %75 = tpu.matmul %72, %74, %cst_82 {dimension_numbers = #tpu.dot_dimension_numbers<[1], [0], [0], [1], [0, 0, 1, 1], [], []>} : vector<64x128xbf16>, vector<128x64xbf16>, vector<64x64xf32> -> vector<64x64xf32>
    %c1_83 = arith.constant 1 : index
    %c0_84 = arith.constant 0 : index
    %c0_85 = arith.constant 0 : index
    %76 = vector.load %arg7[%c1_83, %c0_84, %c0_85] : memref<2x128x64xbf16, #tpu.memory_space<vmem>>, vector<1x128x64xbf16>
    %77 = vector.shape_cast %76 : vector<1x128x64xbf16> to vector<128x64xbf16>
    %cst_86 = arith.constant dense<0.000000e+00> : vector<64x64xf32>
    %78 = tpu.matmul %72, %77, %cst_86 {dimension_numbers = #tpu.dot_dimension_numbers<[1], [0], [0], [1], [0, 0, 1, 1], [], []>} : vector<64x128xbf16>, vector<128x64xbf16>, vector<64x64xf32> -> vector<64x64xf32>
    %79 = arith.maximumf %75, %78 : vector<64x64xf32>
    %c0_87 = arith.constant 0 : index
    %c0_88 = arith.constant 0 : index
    %80 = vector.load %arg18[%c0_87, %c0_88] : memref<64x64xf32, #tpu.memory_space<vmem>>, vector<64x64xf32>
    tpu.vector_store %arg18[%c0_87, %c0_88], %79 {strides = array<i32>} : memref<64x64xf32, #tpu.memory_space<vmem>>, vector<64x64xf32>,
    %c0_89 = arith.constant 0 : index
    %c0_90 = arith.constant 0 : index
    %81 = tpu.strided_load %arg18[%c0_89, %c0_90] {strides = array<i32: 8, 1>} : memref<64x64xf32, #tpu.memory_space<vmem>>, vector<8x64xf32>
    %c1_91 = arith.constant 1 : index
    %c0_92 = arith.constant 0 : index
    %82 = tpu.strided_load %arg18[%c1_91, %c0_92] {strides = array<i32: 8, 1>} : memref<64x64xf32, #tpu.memory_space<vmem>>, vector<8x64xf32>
    %83 = arith.maximumf %81, %82 : vector<8x64xf32>
    %84 = arith.truncf %83 : vector<8x64xf32> to vector<8x64xbf16>
    %c0_93 = arith.constant 0 : index
    %c0_94 = arith.constant 0 : index
    %c0_95 = arith.constant 0 : index
    %85 = vector.load %arg8[%c0_93, %c0_94, %c0_95] : memref<4x64x64xbf16, #tpu.memory_space<vmem>>, vector<1x64x64xbf16>
    %86 = vector.shape_cast %85 : vector<1x64x64xbf16> to vector<64x64xbf16>
    %cst_96 = arith.constant dense<0.000000e+00> : vector<8x64xf32>
    %87 = tpu.matmul %84, %86, %cst_96 {dimension_numbers = #tpu.dot_dimension_numbers<[1], [0], [0], [1], [0, 0, 1, 1], [], []>} : vector<8x64xbf16>, vector<64x64xbf16>, vector<8x64xf32> -> vector<8x64xf32>
    %c2_97 = arith.constant 2 : index
    %c0_98 = arith.constant 0 : index
    %88 = tpu.strided_load %arg18[%c2_97, %c0_98] {strides = array<i32: 8, 1>} : memref<64x64xf32, #tpu.memory_space<vmem>>, vector<8x64xf32>
    %c3 = arith.constant 3 : index
    %c0_99 = arith.constant 0 : index
    %89 = tpu.strided_load %arg18[%c3, %c0_99] {strides = array<i32: 8, 1>} : memref<64x64xf32, #tpu.memory_space<vmem>>, vector<8x64xf32>
    %90 = arith.maximumf %88, %89 : vector<8x64xf32>
    %91 = arith.truncf %90 : vector<8x64xf32> to vector<8x64xbf16>
    %c1_100 = arith.constant 1 : index
    %c0_101 = arith.constant 0 : index
    %c0_102 = arith.constant 0 : index
    %92 = vector.load %arg8[%c1_100, %c0_101, %c0_102] : memref<4x64x64xbf16, #tpu.memory_space<vmem>>, vector<1x64x64xbf16>
    %93 = vector.shape_cast %92 : vector<1x64x64xbf16> to vector<64x64xbf16>
    %cst_103 = arith.constant dense<0.000000e+00> : vector<8x64xf32>
    %94 = tpu.matmul %91, %93, %cst_103 {dimension_numbers = #tpu.dot_dimension_numbers<[1], [0], [0], [1], [0, 0, 1, 1], [], []>} : vector<8x64xbf16>, vector<64x64xbf16>, vector<8x64xf32> -> vector<8x64xf32>
    %95 = arith.addf %87, %94 : vector<8x64xf32>
    %c4 = arith.constant 4 : index
    %c0_104 = arith.constant 0 : index
    %96 = tpu.strided_load %arg18[%c4, %c0_104] {strides = array<i32: 8, 1>} : memref<64x64xf32, #tpu.memory_space<vmem>>, vector<8x64xf32>
    %c5 = arith.constant 5 : index
    %c0_105 = arith.constant 0 : index
    %97 = tpu.strided_load %arg18[%c5, %c0_105] {strides = array<i32: 8, 1>} : memref<64x64xf32, #tpu.memory_space<vmem>>, vector<8x64xf32>
    %98 = arith.maximumf %96, %97 : vector<8x64xf32>
    %99 = arith.truncf %98 : vector<8x64xf32> to vector<8x64xbf16>
    %c2_106 = arith.constant 2 : index
    %c0_107 = arith.constant 0 : index
    %c0_108 = arith.constant 0 : index
    %100 = vector.load %arg8[%c2_106, %c0_107, %c0_108] : memref<4x64x64xbf16, #tpu.memory_space<vmem>>, vector<1x64x64xbf16>
    %101 = vector.shape_cast %100 : vector<1x64x64xbf16> to vector<64x64xbf16>
    %cst_109 = arith.constant dense<0.000000e+00> : vector<8x64xf32>
    %102 = tpu.matmul %99, %101, %cst_109 {dimension_numbers = #tpu.dot_dimension_numbers<[1], [0], [0], [1], [0, 0, 1, 1], [], []>} : vector<8x64xbf16>, vector<64x64xbf16>, vector<8x64xf32> -> vector<8x64xf32>
    %103 = arith.addf %95, %102 : vector<8x64xf32>
    %c6 = arith.constant 6 : index
    %c0_110 = arith.constant 0 : index
    %104 = tpu.strided_load %arg18[%c6, %c0_110] {strides = array<i32: 8, 1>} : memref<64x64xf32, #tpu.memory_space<vmem>>, vector<8x64xf32>
    %c7 = arith.constant 7 : index
    %c0_111 = arith.constant 0 : index
    %105 = tpu.strided_load %arg18[%c7, %c0_111] {strides = array<i32: 8, 1>} : memref<64x64xf32, #tpu.memory_space<vmem>>, vector<8x64xf32>
    %106 = arith.maximumf %104, %105 : vector<8x64xf32>
    %107 = arith.truncf %106 : vector<8x64xf32> to vector<8x64xbf16>
    %c3_112 = arith.constant 3 : index
    %c0_113 = arith.constant 0 : index
    %c0_114 = arith.constant 0 : index
    %108 = vector.load %arg8[%c3_112, %c0_113, %c0_114] : memref<4x64x64xbf16, #tpu.memory_space<vmem>>, vector<1x64x64xbf16>
    %109 = vector.shape_cast %108 : vector<1x64x64xbf16> to vector<64x64xbf16>
    %cst_115 = arith.constant dense<0.000000e+00> : vector<8x64xf32>
    %110 = tpu.matmul %107, %109, %cst_115 {dimension_numbers = #tpu.dot_dimension_numbers<[1], [0], [0], [1], [0, 0, 1, 1], [], []>} : vector<8x64xbf16>, vector<64x64xbf16>, vector<8x64xf32> -> vector<8x64xf32>
    %111 = arith.addf %103, %110 : vector<8x64xf32>
    %c0_116 = arith.constant 0 : index
    %c0_117 = arith.constant 0 : index
    %112 = vector.load %arg9[%c0_116, %c0_117] : memref<1x64xf32, #tpu.memory_space<vmem>>, vector<1x64xf32>
    %113 = vector.broadcast %112 : vector<1x64xf32> to vector<8x64xf32>
    %114 = arith.addf %111, %113 : vector<8x64xf32>
    %cst_118 = arith.constant 0.000000e+00 : f32
    %115 = vector.broadcast %cst_118 : f32 to vector<8x64xf32>
    %116 = arith.maximumf %114, %115 : vector<8x64xf32>
    %117 = arith.truncf %116 : vector<8x64xf32> to vector<8x64xbf16>
    %c0_119 = arith.constant 0 : index
    %c0_120 = arith.constant 0 : index
    %118 = vector.load %arg10[%c0_119, %c0_120] : memref<64x32xbf16, #tpu.memory_space<vmem>>, vector<64x32xbf16>
    %cst_121 = arith.constant dense<0.000000e+00> : vector<8x32xf32>
    %119 = tpu.matmul %117, %118, %cst_121 {dimension_numbers = #tpu.dot_dimension_numbers<[1], [0], [0], [1], [0, 0, 1, 1], [], []>} : vector<8x64xbf16>, vector<64x32xbf16>, vector<8x32xf32> -> vector<8x32xf32>
    %c0_122 = arith.constant 0 : index
    %c0_123 = arith.constant 0 : index
    %120 = vector.load %arg11[%c0_122, %c0_123] : memref<1x32xf32, #tpu.memory_space<vmem>>, vector<1x32xf32>
    %121 = vector.broadcast %120 : vector<1x32xf32> to vector<8x32xf32>
    %122 = arith.addf %119, %121 : vector<8x32xf32>
    %cst_124 = arith.constant 0.000000e+00 : f32
    %123 = vector.broadcast %cst_124 : f32 to vector<8x32xf32>
    %124 = arith.maximumf %122, %123 : vector<8x32xf32>
    %125 = arith.truncf %124 : vector<8x32xf32> to vector<8x32xbf16>
    %c0_125 = arith.constant 0 : index
    %c0_126 = arith.constant 0 : index
    %126 = vector.load %arg12[%c0_125, %c0_126] : memref<32x128xbf16, #tpu.memory_space<vmem>>, vector<32x128xbf16>
    %cst_127 = arith.constant dense<0.000000e+00> : vector<8x128xf32>
    %127 = tpu.matmul %125, %126, %cst_127 {dimension_numbers = #tpu.dot_dimension_numbers<[1], [0], [0], [1], [0, 0, 1, 1], [], []>} : vector<8x32xbf16>, vector<32x128xbf16>, vector<8x128xf32> -> vector<8x128xf32>
    %c0_128 = arith.constant 0 : index
    %c0_129 = arith.constant 0 : index
    %128 = vector.load %arg13[%c0_128, %c0_129] : memref<1x128xf32, #tpu.memory_space<vmem>>, vector<1x128xf32>
    %129 = vector.broadcast %128 : vector<1x128xf32> to vector<8x128xf32>
    %130 = arith.addf %127, %129 : vector<8x128xf32>
    %c0_130 = arith.constant 0 : index
    %c0_131 = arith.constant 0 : index
    %131 = vector.load %arg14[%c0_130, %c0_131] : memref<8x128xf32, #tpu.memory_space<vmem>>, vector<8x128xf32>
    tpu.vector_store %arg14[%c0_130, %c0_131], %130 {strides = array<i32>} : memref<8x128xf32, #tpu.memory_space<vmem>>, vector<8x128xf32>,
    return
  }
  func.func @transform_0(%arg0: i32) -> (i32, i32, i32) {
    %c0_i32 = arith.constant 0 : i32
    %c0_i32_0 = arith.constant 0 : i32
    %c0_i32_1 = arith.constant 0 : i32
    return %arg0, %c0_i32, %c0_i32_0 : i32, i32, i32
  }
  func.func @transform_1(%arg0: i32) -> (i32, i32, i32) {
    %c0_i32 = arith.constant 0 : i32
    %c0_i32_0 = arith.constant 0 : i32
    %c0_i32_1 = arith.constant 0 : i32
    %c0_i32_2 = arith.constant 0 : i32
    return %c0_i32, %c0_i32_0, %c0_i32_1 : i32, i32, i32
  }
  func.func @transform_2(%arg0: i32) -> (i32, i32) {
    %c0_i32 = arith.constant 0 : i32
    %c0_i32_0 = arith.constant 0 : i32
    %c0_i32_1 = arith.constant 0 : i32
    return %c0_i32, %c0_i32_0 : i32, i32
  }
  func.func @transform_3(%arg0: i32) -> (i32, i32, i32) {
    %c0_i32 = arith.constant 0 : i32
    %c0_i32_0 = arith.constant 0 : i32
    %c0_i32_1 = arith.constant 0 : i32
    %c0_i32_2 = arith.constant 0 : i32
    return %c0_i32, %c0_i32_0, %c0_i32_1 : i32, i32, i32
  }
  func.func @transform_4(%arg0: i32) -> (i32, i32) {
    %c0_i32 = arith.constant 0 : i32
    %c0_i32_0 = arith.constant 0 : i32
    %c0_i32_1 = arith.constant 0 : i32
    return %c0_i32, %c0_i32_0 : i32, i32
  }
  func.func @transform_5(%arg0: i32) -> (i32, i32, i32) {
    %c0_i32 = arith.constant 0 : i32
    %c0_i32_0 = arith.constant 0 : i32
    %c0_i32_1 = arith.constant 0 : i32
    %c0_i32_2 = arith.constant 0 : i32
    return %c0_i32, %c0_i32_0, %c0_i32_1 : i32, i32, i32
  }
  func.func @transform_6(%arg0: i32) -> (i32, i32, i32) {
    %c0_i32 = arith.constant 0 : i32
    %c0_i32_0 = arith.constant 0 : i32
    %c0_i32_1 = arith.constant 0 : i32
    %c0_i32_2 = arith.constant 0 : i32
    return %c0_i32, %c0_i32_0, %c0_i32_1 : i32, i32, i32
  }
  func.func @transform_7(%arg0: i32) -> (i32, i32, i32) {
    %c0_i32 = arith.constant 0 : i32
    %c0_i32_0 = arith.constant 0 : i32
    %c0_i32_1 = arith.constant 0 : i32
    %c0_i32_2 = arith.constant 0 : i32
    return %c0_i32, %c0_i32_0, %c0_i32_1 : i32, i32, i32
  }
  func.func @transform_8(%arg0: i32) -> (i32, i32) {
    %c0_i32 = arith.constant 0 : i32
    %c0_i32_0 = arith.constant 0 : i32
    %c0_i32_1 = arith.constant 0 : i32
    return %c0_i32, %c0_i32_0 : i32, i32
  }
  func.func @transform_9(%arg0: i32) -> (i32, i32) {
    %c0_i32 = arith.constant 0 : i32
    %c0_i32_0 = arith.constant 0 : i32
    %c0_i32_1 = arith.constant 0 : i32
    return %c0_i32, %c0_i32_0 : i32, i32
  }
  func.func @transform_10(%arg0: i32) -> (i32, i32) {
    %c0_i32 = arith.constant 0 : i32
    %c0_i32_0 = arith.constant 0 : i32
    %c0_i32_1 = arith.constant 0 : i32
    return %c0_i32, %c0_i32_0 : i32, i32
  }
  func.func @transform_11(%arg0: i32) -> (i32, i32) {
    %c0_i32 = arith.constant 0 : i32
    %c0_i32_0 = arith.constant 0 : i32
    %c0_i32_1 = arith.constant 0 : i32
    return %c0_i32, %c0_i32_0 : i32, i32
  }
  func.func @transform_12(%arg0: i32) -> (i32, i32) {
    %c0_i32 = arith.constant 0 : i32
    %c0_i32_0 = arith.constant 0 : i32
    %c0_i32_1 = arith.constant 0 : i32
    return %c0_i32, %c0_i32_0 : i32, i32
  }
  func.func @transform_13(%arg0: i32) -> (i32, i32) {
    %c0_i32 = arith.constant 0 : i32
    %c0_i32_0 = arith.constant 0 : i32
    return %arg0, %c0_i32 : i32, i32
  }
}

</mosaic_0001>

<bundles_post_ra>
// kernel: mlp_fe_forward.1
= control target key start
LH: loop header
LB: loop body
LE: loop exit
PB: predicated region body
PF: predicated region fallthrough
CT: control target
= control target key end

     0   :  { %vm45_vm0 = vcmask 385024   ;;  %v3038_v1 = vmov 0.0   ;;  %vm78_vm1 = vcmask 392192   ;;  %vm1062_vm2 = vcmask 516096   ;;  %s3630_s1 = inlined_call_operand.vmem [shape: bf16[3,48,128], index: 1, kind: input, shape index: {}]   ;;  %s3631_s0 = inlined_call_operand.vmem [shape: f32[8,16,48], index: 0, kind: input, shape index: {}]   ;;  %s3632_s5 = inlined_call_operand.vmem [shape: bf16[2,128,64], index: 5, kind: input, shape index: {}]   ;;  %s3633_s2 = inlined_call_operand.vmem [shape: f32[1,128], index: 2, kind: input, shape index: {}]   ;;  %s3634_s3 = inlined_call_operand.vmem [shape: bf16[3,64,128], index: 3, kind: input, shape index: {}]   ;;  %s3635_s6 = inlined_call_operand.vmem [shape: bf16[2,128,64], index: 6, kind: input, shape index: {}]   ;;  %s3636_s4 = inlined_call_operand.vmem [shape: f32[1,128], index: 4, kind: input, shape index: {}]   ;;  %s3637_s7 = inlined_call_operand.vmem [shape: bf16[4,64,64], index: 7, kind: input, shape index: {}]   ;;  %s3638_s9 = inlined_call_operand.vmem [shape: bf16[64,32], index: 9, kind: input, shape index: {}]   ;;  %s3639_s8 = inlined_call_operand.vmem [shape: f32[1,64], index: 8, kind: input, shape index: {}]   ;;  %s3640_s11 = inlined_call_operand.vmem [shape: bf16[32,128], index: 11, kind: input, shape index: {}]   ;;  %s3641_s10 = inlined_call_operand.vmem [shape: f32[1,32], index: 10, kind: input, shape index: {}]   ;;  %s3642_s12 = inlined_call_operand.vmem [shape: f32[1,128], index: 12, kind: input, shape index: {}]   ;;  %s3643_s13 = inlined_call_operand.vmem [shape: f32[8,128], index: 13, kind: output, shape index: {}]  }
   0x1   :  { %v2963_v0 = vld [vmem:[%s3630_s1 + $0x18] sm:$0xff]   ;;  %46 = vst.msk [vmem:[#allocation2] sm:$0x1] %vm45_vm0, %v3038_v1  ;;  %47 = vst.msk [vmem:[#allocation2 + $0x18] sm:$0x1] %vm45_vm0, %v3038_v1  ;;  %v2964_v2 = vld [vmem:[%s3630_s1 + $0x20] sm:$0xff]  }
   0x2   :  { %48 = vst.msk [vmem:[#allocation2 + $0x30] sm:$0x1] %vm45_vm0, %v3038_v1  ;;  %49 = vst.msk [vmem:[#allocation2 + $0x48] sm:$0x1] %vm45_vm0, %v3038_v1  ;;  %2619 = vmatprep.subr.bf16.mxu0 %v2963_v0  ;;  %v2965_v3 = vld [vmem:[%s3630_s1 + $0x28] sm:$0xff]   ;;  %v62_v4 = vld [vmem:[%s3631_s0] sm:$0xff] }
   0x3   :  { %50 = vst.msk [vmem:[#allocation2 + $0x60] sm:$0x1] %vm45_vm0, %v3038_v1  ;;  %51 = vst.msk [vmem:[#allocation2 + $0x78] sm:$0x1] %vm45_vm0, %v3038_v1  ;;  %2620 = vmatpush3.bf16.msra.mxu0 %v2963_v0  ;;  %v63_v5 = vld [vmem:[%s3631_s0 + $0x8] sm:$0xff]  ;;  %v64_v6 = vld [vmem:[%s3631_s0 + $0x10] sm:$0xff] }
   0x4   :  { %52 = vst.msk [vmem:[#allocation2 + $0x90] sm:$0x1] %vm45_vm0, %v3038_v1  ;;  %53 = vst.msk [vmem:[#allocation2 + $0xa8] sm:$0x1] %vm45_vm0, %v3038_v1  ;;  %2621 = vmatprep.subr.bf16.mxu0 %v2964_v2  ;;  %v65_v7 = vld [vmem:[%s3631_s0 + $0x18] sm:$0xff]  ;;  %v66_v8 = vld [vmem:[%s3631_s0 + $0x20] sm:$0xff] }
   0x5   :  { %54 = vst.msk [vmem:[#allocation2 + $0x11] sm:$0x1] %vm45_vm0, %v3038_v1  ;;  %55 = vst.msk [vmem:[#allocation2 + $0x29] sm:$0x1] %vm45_vm0, %v3038_v1  ;;  %v67_v9 = vld [vmem:[%s3631_s0 + $0x28] sm:$0xff]  ;;  %v68_v10 = vld [vmem:[%s3631_s0 + $0x30] sm:$0xff] }
   0x6   :  { %56 = vst.msk [vmem:[#allocation2 + $0x41] sm:$0x1] %vm45_vm0, %v3038_v1  ;;  %57 = vst.msk [vmem:[#allocation2 + $0x59] sm:$0x1] %vm45_vm0, %v3038_v1  ;;  %v69_v11 = vld [vmem:[%s3631_s0 + $0x38] sm:$0xff]  ;;  %v2966_v12 = vld [vmem:[%s3630_s1] sm:$0xff]  }
   0x7   :  { %58 = vst.msk [vmem:[#allocation2 + $0x71] sm:$0x1] %vm45_vm0, %v3038_v1  ;;  %59 = vst.msk [vmem:[#allocation2 + $0x89] sm:$0x1] %vm45_vm0, %v3038_v1  ;;  %2622 = vmatpush3.bf16.msra.mxu0 %v2964_v2  ;;  %v70_v13 = vld [vmem:[%s3631_s0 + $0x40] sm:$0xff]  ;;  %v71_v14 = vld [vmem:[%s3631_s0 + $0x48] sm:$0xff] }
   0x8   :  { %60 = vst.msk [vmem:[#allocation2 + $0xa1] sm:$0x1] %vm45_vm0, %v3038_v1  ;;  %61 = vst.msk [vmem:[#allocation2 + $0xb9] sm:$0x1] %vm45_vm0, %v3038_v1  ;;  %2623 = vmatprep.subr.bf16.mxu0 %v2965_v3  ;;  %v72_v15 = vld [vmem:[%s3631_s0 + $0x50] sm:$0xff]  ;;  %v73_v16 = vld [vmem:[%s3631_s0 + $0x58] sm:$0xff] }
   0x9   :  { %79 = vst.msk [vmem:[#allocation2 + $0x1] sm:$0xff] %vm78_vm1, %v62_v4  ;;  %80 = vst.msk [vmem:[#allocation2 + $0x9] sm:$0xff] %vm78_vm1, %v63_v5  ;;  %v74_v17 = vld [vmem:[%s3631_s0 + $0x60] sm:$0xff]  ;;  %v75_v18 = vld [vmem:[%s3631_s0 + $0x68] sm:$0xff]  ;;  %vm1006_vm3 = vcmask 523264   ;;  %vm3039_vm4 = vmmov 0  }
   0xa   :  { %81 = vst.msk [vmem:[#allocation2 + $0x19] sm:$0xff] %vm78_vm1, %v64_v6  ;;  %82 = vst.msk [vmem:[#allocation2 + $0x21] sm:$0xff] %vm78_vm1, %v65_v7  ;;  %v76_v19 = vld [vmem:[%s3631_s0 + $0x70] sm:$0xff]  ;;  %v77_v25 = vld [vmem:[%s3631_s0 + $0x78] sm:$0xff]  ;;  %vm2223_vm5 = vcmask 261120  }
   0xb   :  { %83 = vst.msk [vmem:[#allocation2 + $0x31] sm:$0xff] %vm78_vm1, %v66_v8  ;;  %84 = vst.msk [vmem:[#allocation2 + $0x39] sm:$0xff] %vm78_vm1, %v67_v9  ;;  %2624 = vmatpush3.bf16.msra.mxu0 %v2965_v3  ;;  %v2967_v29 = vld [vmem:[%s3630_s1 + $0x8] sm:$0xff]   ;;  %v2968_v33 = vld [vmem:[%s3630_s1 + $0x10] sm:$0xff]  }
   0xc   :  { %85 = vst.msk [vmem:[#allocation2 + $0x49] sm:$0xff] %vm78_vm1, %v68_v10  ;;  %86 = vst.msk [vmem:[#allocation2 + $0x51] sm:$0xff] %vm78_vm1, %v69_v11  ;;  %2641 = vmatprep.subr.bf16.mxu0 %v2966_v12  ;;  %v2969_v38 = vld [vmem:[%s3630_s1 + $0x30] sm:$0xff]   ;;  %v2972_v48 = vld [vmem:[%s3632_s5] sm:$0xff]  }
   0xd   :  { %87 = vst.msk [vmem:[#allocation2 + $0x61] sm:$0xff] %vm78_vm1, %v70_v13  ;;  %88 = vst.msk [vmem:[#allocation2 + $0x69] sm:$0xff] %vm78_vm1, %v71_v14  ;;  %v2973_v49 = vld [vmem:[%s3632_s5 + $0x8] sm:$0xff]   ;;  %2685 = vmatprep.subr.bf16.mxu1 %v2972_v48  ;;  %v2974_v52 = vld [vmem:[%s3632_s5 + $0x10] sm:$0xff]  }
   0xe   :  { %89 = vst.msk [vmem:[#allocation2 + $0x79] sm:$0xff] %vm78_vm1, %v72_v15  ;;  %90 = vst.msk [vmem:[#allocation2 + $0x81] sm:$0xff] %vm78_vm1, %v73_v16  ;;  %2686 = vmatpush3.bf16.msra.mxu1 %v2972_v48  ;;  %v2975_v54 = vld [vmem:[%s3632_s5 + $0x18] sm:$0xff]   ;;  %v2976_v60 = vld [vmem:[%s3632_s5 + $0x20] sm:$0xff]  }
   0xf   :  { %91 = vst.msk [vmem:[#allocation2 + $0x91] sm:$0xff] %vm78_vm1, %v74_v17  ;;  %92 = vst.msk [vmem:[#allocation2 + $0x99] sm:$0xff] %vm78_vm1, %v75_v18  ;;  %2687 = vmatprep.subr.bf16.mxu1 %v2973_v49  ;;  %v2970_v62 = vld [vmem:[%s3630_s1 + $0x38] sm:$0xff]   ;;  %v2977_v63 = vld [vmem:[%s3632_s5 + $0x28] sm:$0xff]  }
  0x10   :  { %v125_v20 = vld [vmem:[#allocation2 + $0x1] sm:$0xff]  ;;  %v126_v21 = vld [vmem:[#allocation2 + $0x9] sm:$0xff]  ;;  %93 = vst.msk [vmem:[#allocation2 + $0xa9] sm:$0xff] %vm78_vm1, %v76_v19  ;;  %94 = vst.msk [vmem:[#allocation2 + $0xb1] sm:$0xff] %vm78_vm1, %v77_v25 }
  0x11   :  { %v127_v22 = vld [vmem:[#allocation2 + $0x19] sm:$0xff]  ;;  %v141_v23 = vpack.c.bf16 %v126_v21, %v125_v20  ;;  %v128_v24 = vld [vmem:[#allocation2 + $0x21] sm:$0xff]  ;;  %v435_v17 = vld [vmem:[#allocation2 + $0xa] sm:$0xff]  ;;  %1063 = vst.msk [vmem:[#allocation4] sm:$0x1] %vm1062_vm2, %v3038_v1 }
  0x12   :  { %v142_v26 = vpack.c.bf16 %v128_v24, %v127_v22  ;;  %v129_v27 = vld [vmem:[#allocation2 + $0x31] sm:$0xff]  ;;  %v130_v28 = vld [vmem:[#allocation2 + $0x39] sm:$0xff]  ;;  %v96_v50 = vld [vmem:[#allocation2 + $0x8] sm:$0xff]  ;;  %2688 = vmatpush3.bf16.msra.mxu1 %v2973_v49  ;;  %1064 = vst.msk [vmem:[#allocation4 + $0x10] sm:$0x1] %vm1062_vm2, %v3038_v1 }
  0x13   :  { %2625 = vmatprep.mubr.msk.bf16.mxu0 %vm78_vm1, %v141_v23  ;;  %v143_v30 = vpack.c.bf16 %v130_v28, %v129_v27  ;;  %v131_v31 = vld [vmem:[#allocation2 + $0x49] sm:$0xff]  ;;  %v132_v32 = vld [vmem:[#allocation2 + $0x51] sm:$0xff]  ;;  %v95_v47 = vld [vmem:[#allocation2] sm:$0xff]  ;;  %2689 = vmatprep.subr.bf16.mxu1 %v2974_v52  ;;  %1065 = vst.msk [vmem:[#allocation4 + $0x20] sm:$0x1] %vm1062_vm2, %v3038_v1 }
  0x14   :  { %2626 = vmatmul.mubr.msk.bf16.vlgmr.msra.gmra.mrb[0].mxu0 %vm78_vm1, %v142_v26  ;;  %v133_v34 = vld [vmem:[#allocation2 + $0x61] sm:$0xff]  ;;  %v134_v35 = vld [vmem:[#allocation2 + $0x69] sm:$0xff]  ;;  %v144_v36 = vpack.c.bf16 %v132_v32, %v131_v31  ;;  %v111_v53 = vpack.c.bf16 %v96_v50, %v95_v47  ;;  %v97_v55 = vld [vmem:[#allocation2 + $0x18] sm:$0xff]  ;;  %1066 = vst.msk [vmem:[#allocation4 + $0x30] sm:$0x1] %vm1062_vm2, %v3038_v1 }
  0x15   :  { %2642 = vmatpush3.bf16.msra.mxu0 %v2966_v12  ;;  %2629 = vmatprep.mubr.msk.bf16.mxu0 %vm78_vm1, %v143_v30  ;;  %v145_v37 = vpack.c.bf16 %v134_v35, %v133_v34  ;;  %v135_v39 = vld [vmem:[#allocation2 + $0x79] sm:$0xff]  ;;  %v136_v40 = vld [vmem:[#allocation2 + $0x81] sm:$0xff]  ;;  %v99_v57 = vld [vmem:[#allocation2 + $0x30] sm:$0xff]  ;;  %1067 = vst.msk [vmem:[#allocation4 + $0x40] sm:$0x1] %vm1062_vm2, %v3038_v1 }
  0x16   :  { %2643 = vmatprep.subr.bf16.mxu0 %v2967_v29  ;;  %v137_v41 = vld [vmem:[#allocation2 + $0x91] sm:$0xff]  ;;  %v138_v42 = vld [vmem:[#allocation2 + $0x99] sm:$0xff]  ;;  %v146_v43 = vpack.c.bf16 %v136_v40, %v135_v39  ;;  %2690 = vmatpush3.bf16.msra.mxu1 %v2974_v52  ;;  %v101_v0 = vld [vmem:[#allocation2 + $0x48] sm:$0xff]  ;;  %1068 = vst.msk [vmem:[#allocation4 + $0x50] sm:$0x1] %vm1062_vm2, %v3038_v1 }
  0x17   :  { %v147_v44 = vpack.c.bf16 %v138_v42, %v137_v41  ;;  %v139_v45 = vld [vmem:[#allocation2 + $0xa9] sm:$0xff]  ;;  %v140_v46 = vld [vmem:[#allocation2 + $0xb1] sm:$0xff]  ;;  %v98_v56 = vld [vmem:[#allocation2 + $0x20] sm:$0xff]  ;;  %2691 = vmatprep.subr.bf16.mxu1 %v2975_v54  ;;  %1069 = vst.msk [vmem:[#allocation4 + $0x60] sm:$0x1] %vm1062_vm2, %v3038_v1 }
  0x18   :  { %v148_v51 = vpack.c.bf16 %v140_v46, %v139_v45  ;;  %v100_v58 = vld [vmem:[#allocation2 + $0x38] sm:$0xff]  ;;  %v112_v59 = vpack.c.bf16 %v98_v56, %v97_v55  ;;  %v102_v2 = vld [vmem:[#allocation2 + $0x50] sm:$0xff]  ;;  %v103_v3 = vld [vmem:[#allocation2 + $0x60] sm:$0xff]  ;;  %1070 = vst.msk [vmem:[#allocation4 + $0x70] sm:$0x1] %vm1062_vm2, %v3038_v1 }
  0x19   :  { %2644 = vmatpush3.bf16.msra.mxu0 %v2967_v29  ;;  %v113_v61 = vpack.c.bf16 %v100_v58, %v99_v57  ;;  %v104_v4 = vld [vmem:[#allocation2 + $0x68] sm:$0xff]  ;;  %v2971_v5 = vld [vmem:[%s3630_s1 + $0x40] sm:$0xff]   ;;  %v114_v6 = vpack.c.bf16 %v102_v2, %v101_v0  ;;  %v105_v8 = vld [vmem:[#allocation2 + $0x78] sm:$0xff]  ;;  %1071 = vst.msk [vmem:[#allocation4 + $0x9] sm:$0x1] %vm1062_vm2, %v3038_v1 }
  0x1a   :  { %2645 = vmatprep.subr.bf16.mxu0 %v2968_v33  ;;  %2692 = vmatpush3.bf16.msra.mxu1 %v2975_v54  ;;  %v115_v7 = vpack.c.bf16 %v104_v4, %v103_v3  ;;  %v106_v9 = vld [vmem:[#allocation2 + $0x80] sm:$0xff]  ;;  %v107_v10 = vld [vmem:[#allocation2 + $0x90] sm:$0xff]  ;;  %v108_v11 = vld [vmem:[#allocation2 + $0x98] sm:$0xff]  ;;  %1072 = vst.msk [vmem:[#allocation4 + $0x19] sm:$0x1] %vm1062_vm2, %v3038_v1 }
  0x1b   :  { %2693 = vmatprep.subr.bf16.mxu1 %v2976_v60  ;;  %v116_v12 = vpack.c.bf16 %v106_v9, %v105_v8  ;;  %v117_v13 = vpack.c.bf16 %v108_v11, %v107_v10  ;;  %v109_v14 = vld [vmem:[#allocation2 + $0xa8] sm:$0xff]  ;;  %v110_v15 = vld [vmem:[#allocation2 + $0xb0] sm:$0xff]  ;;  %v436_v20 = vld [vmem:[#allocation2 + $0x1a] sm:$0xff]  ;;  %1073 = vst.msk [vmem:[#allocation4 + $0x29] sm:$0x1] %vm1062_vm2, %v3038_v1 }
  0x1c   :  { %2630 = vmatmul.mubr.msk.bf16.gmra.mrb[4].mxu0 %vm78_vm1, %v144_v36  ;;  %v434_v16 = vld [vmem:[#allocation2 + $0x2] sm:$0xff]  ;;  %v118_v18 = vpack.c.bf16 %v110_v15, %v109_v14  ;;  %v438_v22 = vld [vmem:[#allocation2 + $0x32] sm:$0xff]  ;;  %v439_v23 = vld [vmem:[#allocation2 + $0x3a] sm:$0xff]  ;;  %1074 = vst.msk [vmem:[#allocation4 + $0x39] sm:$0x1] %vm1062_vm2, %v3038_v1 }
  0x1d   :  { %2633 = vmatprep.mubr.msk.bf16.mxu0 %vm78_vm1, %v145_v37  ;;  %2646 = vmatpush3.bf16.msra.mxu0 %v2968_v33  ;;  %v450_v19 = vpack.c.bf16 %v435_v17, %v434_v16  ;;  %v437_v21 = vld [vmem:[#allocation2 + $0x22] sm:$0xff]  ;;  %v452_v25 = vpack.c.bf16 %v439_v23, %v438_v22  ;;  %v440_v26 = vld [vmem:[#allocation2 + $0x4a] sm:$0xff]  ;;  %v441_v27 = vld [vmem:[#allocation2 + $0x52] sm:$0xff]  ;;  %1075 = vst.msk [vmem:[#allocation4 + $0x49] sm:$0x1] %vm1062_vm2, %v3038_v1 }
  0x1e   :  { %2663 = vmatprep.subr.bf16.mxu0 %v2969_v38  ;;  %2694 = vmatpush3.bf16.msra.mxu1 %v2976_v60  ;;  %v451_v24 = vpack.c.bf16 %v437_v21, %v436_v20  ;;  %v442_v28 = vld [vmem:[#allocation2 + $0x62] sm:$0xff]  ;;  %v443_v29 = vld [vmem:[#allocation2 + $0x6a] sm:$0xff]  ;;  %v453_v30 = vpack.c.bf16 %v441_v27, %v440_v26  ;;  %v444_v32 = vld [vmem:[#allocation2 + $0x7a] sm:$0xff]  ;;  %1076 = vst.msk [vmem:[#allocation4 + $0x59] sm:$0x1] %vm1062_vm2, %v3038_v1 }
  0x1f   :  { %2695 = vmatprep.subr.bf16.mxu1 %v2977_v63  ;;  %v454_v31 = vpack.c.bf16 %v443_v29, %v442_v28  ;;  %v445_v33 = vld [vmem:[#allocation2 + $0x82] sm:$0xff]  ;;  %v446_v34 = vld [vmem:[#allocation2 + $0x92] sm:$0xff]  ;;  %v447_v35 = vld [vmem:[#allocation2 + $0x9a] sm:$0xff]  ;;  %1077 = vst.msk [vmem:[#allocation4 + $0x69] sm:$0x1] %vm1062_vm2, %v3038_v1 }
  0x20   :  { %v455_v36 = vpack.c.bf16 %v445_v33, %v444_v32  ;;  %v456_v37 = vpack.c.bf16 %v447_v35, %v446_v34  ;;  %v449_v39 = vld [vmem:[#allocation2 + $0xb2] sm:$0xff]  ;;  %v2984_v23 = vld [vmem:[%s3632_s5 + $0x60] sm:$0xff]   ;;  %1078 = vst.msk [vmem:[#allocation4 + $0x79] sm:$0x1] %vm1062_vm2, %v3038_v1 }
  0x21   :  { %v2978_v41 = vld [vmem:[%s3632_s5 + $0x30] sm:$0xff]   ;;  %v2979_v42 = vld [vmem:[%s3632_s5 + $0x38] sm:$0xff]  }
  0x22   :  { %2696 = vmatpush3.bf16.msra.mxu1 %v2977_v63  ;;  %v2983_v15 = vld [vmem:[%s3632_s5 + $0x58] sm:$0xff]  }
  0x23   :  { %2697 = vmatprep.subr.bf16.mxu1 %v2978_v41 }
  0x24   :  { %2634 = vmatmul.mubr.msk.bf16.gmra.mrb[8].mxu0 %vm78_vm1, %v146_v43  ;;  %v2980_v43 = vld [vmem:[%s3632_s5 + $0x40] sm:$0xff]  }
  0x25   :  { %2637 = vmatprep.mubr.msk.bf16.mxu0 %vm78_vm1, %v147_v44  ;;  %v3287_v44 = vld [vmem:[%s3633_s2] ss:$0 sm:$0xff] }
  0x26   :  { %2698 = vmatpush3.bf16.msra.mxu1 %v2978_v41 }
  0x27   :  { %2699 = vmatprep.subr.bf16.mxu1 %v2979_v42 }
  0x2a   :  { %2700 = vmatpush3.bf16.msra.mxu1 %v2979_v42 }
  0x2b   :  { %2717 = vmatprep.subr.bf16.mxu1 %v2980_v43 }
  0x2c   :  { %2638 = vmatmul.mubr.msk.bf16.gmra.mrb[12].mxu0 %vm78_vm1, %v148_v51 }
  0x2d   :  { %2647 = vmatprep.mubr.msk.bf16.mxu0 %vm78_vm1, %v111_v53 }
  0x34   :  { %2648 = vmatmul.mubr.msk.bf16.vlgmr.msra.gmra.mrb[0].mxu0 %vm78_vm1, %v112_v59 }
  0x35   :  { %2664 = vmatpush3.bf16.msra.mxu0 %v2969_v38  ;;  %2651 = vmatprep.mubr.msk.bf16.mxu0 %vm78_vm1, %v113_v61  ;;  %v448_v38 = vld [vmem:[#allocation2 + $0xaa] sm:$0xff] }
  0x36   :  { %2665 = vmatprep.subr.bf16.mxu0 %v2970_v62  ;;  %v457_v40 = vpack.c.bf16 %v449_v39, %v448_v38  ;;  %v2986_v39 = vld [vmem:[%s3632_s5 + $0x70] sm:$0xff]  }
  0x39   :  { %2666 = vmatpush3.bf16.msra.mxu0 %v2970_v62  ;;  %v2981_v62 = vld [vmem:[%s3632_s5 + $0x48] sm:$0xff]  }
  0x3a   :  { %2667 = vmatprep.subr.bf16.mxu0 %v2971_v5 }
  0x3c   :  { %2652 = vmatmul.mubr.msk.bf16.gmra.mrb[4].mxu0 %vm78_vm1, %v114_v6 }
  0x3d   :  { %2655 = vmatprep.mubr.msk.bf16.mxu0 %vm78_vm1, %v115_v7  ;;  %2668 = vmatpush3.bf16.msra.mxu0 %v2971_v5  ;;  %v2982_v7 = vld [vmem:[%s3632_s5 + $0x50] sm:$0xff]  }
  0x44   :  { %2656 = vmatmul.mubr.msk.bf16.gmra.mrb[8].mxu0 %vm78_vm1, %v116_v12 }
  0x45   :  { %2659 = vmatprep.mubr.msk.bf16.mxu0 %vm78_vm1, %v117_v13 }
  0x4c   :  { %2660 = vmatmul.mubr.msk.bf16.gmra.mrb[12].mxu0 %vm78_vm1, %v118_v18 }
  0x4d   :  { %2669 = vmatprep.mubr.msk.bf16.mxu0 %vm78_vm1, %v450_v19 }
  0x54   :  { %2670 = vmatmul.mubr.msk.bf16.vlgmr.msra.gmra.mrb[0].mxu0 %vm78_vm1, %v451_v24 }
  0x55   :  { %2673 = vmatprep.mubr.msk.bf16.mxu0 %vm78_vm1, %v452_v25 }
  0x5c   :  { %2674 = vmatmul.mubr.msk.bf16.gmra.mrb[4].mxu0 %vm78_vm1, %v453_v30 }
  0x5d   :  { %2677 = vmatprep.mubr.msk.bf16.mxu0 %vm78_vm1, %v454_v31  ;;  %v2985_v31 = vld [vmem:[%s3632_s5 + $0x68] sm:$0xff]  }
  0x64   :  { %2678 = vmatmul.mubr.msk.bf16.gmra.mrb[8].mxu0 %vm78_vm1, %v455_v36 }
  0x65   :  { %2681 = vmatprep.mubr.msk.bf16.mxu0 %vm78_vm1, %v456_v37 }
  0x6c   :  { %2682 = vmatmul.mubr.msk.bf16.gmra.mrb[12].mxu0 %vm78_vm1, %v457_v40 }
 0x127   :  { %v2671_v45 = vpop.f32.mrb[0].mxu0 }
 0x128   :  { %v629_v46 = vadd.f32 %v2671_v45, %v3287_v44  ;;  %v541_v47 = vpop.f32.mrb[1].mxu0  ;;  %v2987_v45 = vld [vmem:[%s3632_s5 + $0x78] sm:$0xff]  }
 0x129   :  { %v627_v48 = vadd.f32 %v3287_v44, %v541_v47  ;;  %v2672_v49 = vpop.f32.mrb[2].mxu0  ;;  %v2990_v47 = vld [vmem:[%s3634_s3 + $0x30] sm:$0xff]  }
 0x12a   :  { %v630_v50 = vadd.f32 %v2672_v49, %v3287_v44  ;;  %v544_v51 = vpop.f32.mrb[3].mxu0  ;;  %v645_v53 = vmax.f32 %v629_v46, 0.0  ;;  %v2989_v46 = vld [vmem:[%s3634_s3 + $0x28] sm:$0xff]   ;;  %v3381_v49 = vld [vmem:[%s3634_s3] sm:$0xff]  }
 0x12b   :  { %v628_v52 = vadd.f32 %v3287_v44, %v544_v51  ;;  %v643_v55 = vmax.f32 %v627_v48, 0.0  ;;  %v2991_v48 = vld [vmem:[%s3634_s3 + $0x38] sm:$0xff]   ;;  %v3001_v51 = vld [vmem:[%s3635_s6 + $0x8] sm:$0xff]  }
 0x12c   :  { %v646_v54 = vmax.f32 %v630_v50, 0.0  ;;  %v3000_v50 = vld [vmem:[%s3635_s6] sm:$0xff]  }
 0x12d   :  { %v644_v56 = vmax.f32 %v628_v52, 0.0  ;;  %2797 = vmatprep.subr.bf16.mxu0 %v3000_v50  ;;  %v3002_v52 = vld [vmem:[%s3635_s6 + $0x10] sm:$0xff]  }
 0x12e   :  { %v3293_v57 = vpack.c.bf16 %v646_v54, %v645_v53  ;;  %2798 = vmatpush3.bf16.msra.mxu0 %v3000_v50  ;;  %v3003_v53 = vld [vmem:[%s3635_s6 + $0x18] sm:$0xff]   ;;  %v3004_v54 = vld [vmem:[%s3635_s6 + $0x20] sm:$0xff]  }
 0x12f   :  { %v2675_v58 = vpop.f32.mrb[4].mxu0  ;;  %v3295_v59 = vpack.c.bf16 %v644_v56, %v643_v55  ;;  %2799 = vmatprep.subr.bf16.mxu0 %v3001_v51 }
 0x130   :  { %v633_v60 = vadd.f32 %v2675_v58, %v3287_v44  ;;  %v557_v61 = vpop.f32.mrb[5].mxu0 }
 0x131   :  { %v631_v63 = vadd.f32 %v3287_v44, %v557_v61  ;;  %v2676_v0 = vpop.f32.mrb[6].mxu0  ;;  %2701 = vmatprep.mubr.bf16.mxu1 %v3295_v59 }
 0x132   :  { %v634_v2 = vadd.f32 %v2676_v0, %v3287_v44  ;;  %v560_v3 = vpop.f32.mrb[7].mxu0  ;;  %2702 = vmatmul.mubr.bf16.vlgmr.msra.gmra.mrb[0].mxu1 %v3293_v57  ;;  %v649_v5 = vmax.f32 %v633_v60, 0.0  ;;  %2800 = vmatpush3.bf16.msra.mxu0 %v3001_v51 }
 0x133   :  { %v632_v4 = vadd.f32 %v3287_v44, %v560_v3  ;;  %2718 = vmatpush3.bf16.msra.mxu1 %v2980_v43  ;;  %v647_v8 = vmax.f32 %v631_v63, 0.0  ;;  %2801 = vmatprep.subr.bf16.mxu0 %v3002_v52 }
 0x134   :  { %v650_v6 = vmax.f32 %v634_v2, 0.0  ;;  %2719 = vmatprep.subr.bf16.mxu1 %v2981_v62 }
 0x135   :  { %v648_v9 = vmax.f32 %v632_v4, 0.0 }
 0x136   :  { %v662_v10 = vpack.c.bf16 %v650_v6, %v649_v5  ;;  %2802 = vmatpush3.bf16.msra.mxu0 %v3002_v52 }
 0x137   :  { %v661_v11 = vpack.c.bf16 %v648_v9, %v647_v8  ;;  %v2679_v12 = vpop.f32.mrb[8].mxu0  ;;  %2720 = vmatpush3.bf16.msra.mxu1 %v2981_v62  ;;  %2803 = vmatprep.subr.bf16.mxu0 %v3003_v53 }
 0x138   :  { %v637_v13 = vadd.f32 %v2679_v12, %v3287_v44  ;;  %v573_v14 = vpop.f32.mrb[9].mxu0  ;;  %2721 = vmatprep.subr.bf16.mxu1 %v2982_v7 }
 0x139   :  { %v635_v16 = vadd.f32 %v3287_v44, %v573_v14  ;;  %v2680_v17 = vpop.f32.mrb[10].mxu0  ;;  %2705 = vmatprep.mubr.bf16.mxu1 %v661_v11 }
 0x13a   :  { %v638_v18 = vadd.f32 %v2680_v17, %v3287_v44  ;;  %v576_v19 = vpop.f32.mrb[11].mxu0  ;;  %2706 = vmatmul.mubr.bf16.gmra.mrb[4].mxu1 %v662_v10  ;;  %v653_v21 = vmax.f32 %v637_v13, 0.0  ;;  %2804 = vmatpush3.bf16.msra.mxu0 %v3003_v53 }
 0x13b   :  { %v636_v20 = vadd.f32 %v3287_v44, %v576_v19  ;;  %2722 = vmatpush3.bf16.msra.mxu1 %v2982_v7  ;;  %v651_v24 = vmax.f32 %v635_v16, 0.0  ;;  %2805 = vmatprep.subr.bf16.mxu0 %v3004_v54 }
 0x13c   :  { %v654_v22 = vmax.f32 %v638_v18, 0.0  ;;  %2723 = vmatprep.subr.bf16.mxu1 %v2983_v15 }
 0x13d   :  { %v652_v25 = vmax.f32 %v636_v20, 0.0 }
 0x13e   :  { %v664_v26 = vpack.c.bf16 %v654_v22, %v653_v21  ;;  %2806 = vmatpush3.bf16.msra.mxu0 %v3004_v54 }
 0x13f   :  { %v663_v27 = vpack.c.bf16 %v652_v25, %v651_v24  ;;  %v2683_v28 = vpop.f32.mrb[12].mxu0  ;;  %2724 = vmatpush3.bf16.msra.mxu1 %v2983_v15 }
 0x140   :  { %v641_v29 = vadd.f32 %v2683_v28, %v3287_v44  ;;  %v589_v30 = vpop.f32.mrb[13].mxu0  ;;  %2725 = vmatprep.subr.bf16.mxu1 %v2984_v23 }
 0x141   :  { %v639_v32 = vadd.f32 %v3287_v44, %v589_v30  ;;  %v2684_v33 = vpop.f32.mrb[14].mxu0  ;;  %2709 = vmatprep.mubr.bf16.mxu1 %v663_v27 }
 0x142   :  { %v642_v34 = vadd.f32 %v2684_v33, %v3287_v44  ;;  %v592_v35 = vpop.f32.mrb[15].mxu0  ;;  %2710 = vmatmul.mubr.bf16.gmra.mrb[8].mxu1 %v664_v26  ;;  %v657_v37 = vmax.f32 %v641_v29, 0.0 }
 0x143   :  { %v640_v36 = vadd.f32 %v3287_v44, %v592_v35  ;;  %2726 = vmatpush3.bf16.msra.mxu1 %v2984_v23  ;;  %v655_v40 = vmax.f32 %v639_v32, 0.0  ;;  %v2988_v44 = vld [vmem:[%s3634_s3 + $0x20] sm:$0xff]  }
 0x144   :  { %v658_v38 = vmax.f32 %v642_v34, 0.0  ;;  %2727 = vmatprep.subr.bf16.mxu1 %v2985_v31 }
 0x145   :  { %v656_v41 = vmax.f32 %v640_v36, 0.0 }
 0x146   :  { %v666_v42 = vpack.c.bf16 %v658_v38, %v657_v37 }
 0x147   :  { %v665_v43 = vpack.c.bf16 %v656_v41, %v655_v40  ;;  %2728 = vmatpush3.bf16.msra.mxu1 %v2985_v31 }
 0x148   :  { %2729 = vmatprep.subr.bf16.mxu1 %v2986_v39 }
 0x149   :  { %2713 = vmatprep.mubr.bf16.mxu1 %v665_v43 }
 0x14a   :  { %2714 = vmatmul.mubr.bf16.gmra.mrb[12].mxu1 %v666_v42 }
 0x14b   :  { %2730 = vmatpush3.bf16.msra.mxu1 %v2986_v39  ;;  %2733 = vmatprep.mubr.bf16.mxu1 %v3295_v59  ;;  %v3005_v59 = vld [vmem:[%s3635_s6 + $0x28] sm:$0xff]  }
 0x14c   :  { %2731 = vmatprep.subr.bf16.mxu1 %v2987_v45  ;;  %2807 = vmatprep.subr.bf16.mxu0 %v3005_v59 }
 0x14d   :  { %2808 = vmatpush3.bf16.msra.mxu0 %v3005_v59 }
 0x14f   :  { %2732 = vmatpush3.bf16.msra.mxu1 %v2987_v45 }
 0x150   :  { %2749 = vmatprep.subr.bf16.mxu1 %v2988_v44 }
 0x152   :  { %2734 = vmatmul.mubr.bf16.vlgmr.msra.gmra.mrb[16].mxu1 %v3293_v57 }
 0x153   :  { %2737 = vmatprep.mubr.bf16.mxu1 %v661_v11  ;;  %2750 = vmatpush3.bf16.msra.mxu1 %v2988_v44 }
 0x154   :  { %2751 = vmatprep.subr.bf16.mxu1 %v2989_v46 }
 0x157   :  { %2752 = vmatpush3.bf16.msra.mxu1 %v2989_v46 }
 0x158   :  { %2753 = vmatprep.subr.bf16.mxu1 %v2990_v47 }
 0x15a   :  { %2738 = vmatmul.mubr.bf16.gmra.mrb[20].mxu1 %v662_v10 }
 0x15b   :  { %2741 = vmatprep.mubr.bf16.mxu1 %v663_v27  ;;  %2754 = vmatpush3.bf16.msra.mxu1 %v2990_v47 }
 0x15c   :  { %2755 = vmatprep.subr.bf16.mxu1 %v2991_v48 }
 0x15f   :  { %2756 = vmatpush3.bf16.msra.mxu1 %v2991_v48 }
 0x160   :  { %2765 = vmatprep.subr.bf16.mxu1 %v3381_v49 }
 0x162   :  { %2742 = vmatmul.mubr.bf16.gmra.mrb[24].mxu1 %v664_v26 }
 0x163   :  { %2745 = vmatprep.mubr.bf16.mxu1 %v665_v43 }
 0x16a   :  { %2746 = vmatmul.mubr.bf16.gmra.mrb[28].mxu1 %v666_v42 }
 0x205   :  { %v2703_v55 = vpop.f32.mrb[0].mxu1 }
 0x206   :  { %v765_v56 = vpop.f32.mrb[1].mxu1 }
 0x207   :  { %v2704_v57 = vpop.f32.mrb[2].mxu1 }
 0x208   :  { %v768_v58 = vpop.f32.mrb[3].mxu1 }
 0x20d   :  { %v2707_v60 = vpop.f32.mrb[4].mxu1 }
 0x20e   :  { %v781_v61 = vpop.f32.mrb[5].mxu1 }
 0x20f   :  { %v2708_v62 = vpop.f32.mrb[6].mxu1 }
 0x210   :  { %v784_v63 = vpop.f32.mrb[7].mxu1 }
 0x215   :  { %v2711_v0 = vpop.f32.mrb[8].mxu1 }
 0x216   :  { %v797_v2 = vpop.f32.mrb[9].mxu1 }
 0x217   :  { %v2712_v3 = vpop.f32.mrb[10].mxu1 }
 0x218   :  { %v800_v4 = vpop.f32.mrb[11].mxu1 }
 0x21d   :  { %v3402_v5 = vpop.f32.mrb[12].mxu1 }
 0x21e   :  { %v3404_v6 = vpop.f32.mrb[13].mxu1 }
 0x21f   :  { %v3406_v7 = vpop.f32.mrb[14].mxu1 }
 0x220   :  { %v3408_v8 = vpop.f32.mrb[15].mxu1 }
 0x225   :  { %v2735_v9 = vpop.f32.mrb[16].mxu1 }
 0x226   :  { %v992_v10 = vmax.f32 %v2703_v55, %v2735_v9  ;;  %v927_v11 = vpop.f32.mrb[17].mxu1 }
 0x227   :  { %v990_v12 = vmax.f32 %v765_v56, %v927_v11  ;;  %v2736_v13 = vpop.f32.mrb[18].mxu1 }
 0x228   :  { %1009 = vst.msk [vmem:[#allocation3 + $0x10] sm:$0xff] %vm1006_vm3, %v992_v10  ;;  %v993_v14 = vmax.f32 %v2704_v57, %v2736_v13  ;;  %v930_v15 = vpop.f32.mrb[19].mxu1 }
 0x229   :  { %1007 = vst.msk [vmem:[#allocation3] sm:$0xff] %vm1006_vm3, %v990_v12  ;;  %v991_v16 = vmax.f32 %v768_v58, %v930_v15 }
 0x22a   :  { %1010 = vst.msk [vmem:[#allocation3 + $0x18] sm:$0xff] %vm1006_vm3, %v993_v14  ;;  %v2996_v14 = vld [vmem:[%s3634_s3 + $0x40] sm:$0xff]  }
 0x22b   :  { %1008 = vst.msk [vmem:[#allocation3 + $0x8] sm:$0xff] %vm1006_vm3, %v991_v16 }
 0x22d   :  { %v2739_v17 = vpop.f32.mrb[20].mxu1 }
 0x22e   :  { %v996_v18 = vmax.f32 %v2707_v60, %v2739_v17  ;;  %v943_v19 = vpop.f32.mrb[21].mxu1 }
 0x22f   :  { %v994_v20 = vmax.f32 %v781_v61, %v943_v19  ;;  %v2740_v21 = vpop.f32.mrb[22].mxu1 }
 0x230   :  { %1013 = vst.msk [vmem:[#allocation3 + $0x30] sm:$0xff] %vm1006_vm3, %v996_v18  ;;  %v997_v22 = vmax.f32 %v2708_v62, %v2740_v21  ;;  %v946_v23 = vpop.f32.mrb[23].mxu1 }
 0x231   :  { %v1025_v24 = vld [vmem:[#allocation3 + $0x10] ss:$2 sm:$0xff]  ;;  %v1041_v25 = vld [vmem:[#allocation3 + $0x11] ss:$2 sm:$0xff]  ;;  %1011 = vst.msk [vmem:[#allocation3 + $0x20] sm:$0xff] %vm1006_vm3, %v994_v20  ;;  %v995_v26 = vmax.f32 %v784_v63, %v946_v23 }
 0x232   :  { %v1055_v27 = vmax.f32 %v1025_v24, %v1041_v25  ;;  %v1023_v28 = vld [vmem:[#allocation3] ss:$2 sm:$0xff]  ;;  %v1039_v29 = vld [vmem:[#allocation3 + $0x1] ss:$2 sm:$0xff]  ;;  %1014 = vst.msk [vmem:[#allocation3 + $0x38] sm:$0xff] %vm1006_vm3, %v997_v22 }
 0x233   :  { %v1054_v30 = vmax.f32 %v1023_v28, %v1039_v29  ;;  %1012 = vst.msk [vmem:[#allocation3 + $0x28] sm:$0xff] %vm1006_vm3, %v995_v26  ;;  %v2997_v26 = vld [vmem:[%s3634_s3 + $0x48] sm:$0xff]   ;;  %v2998_v28 = vld [vmem:[%s3634_s3 + $0x50] sm:$0xff]  }
 0x234   :  { %1080 = vst.msk [vmem:[#allocation4 + $0x11] sm:$0xff] %vm1006_vm3, %v1055_v27 }
 0x235   :  { %1079 = vst.msk [vmem:[#allocation4 + $0x1] sm:$0xff] %vm1006_vm3, %v1054_v30  ;;  %v2743_v31 = vpop.f32.mrb[24].mxu1 }
 0x236   :  { %v1000_v32 = vmax.f32 %v2711_v0, %v2743_v31  ;;  %v959_v33 = vpop.f32.mrb[25].mxu1 }
 0x237   :  { %v998_v34 = vmax.f32 %v797_v2, %v959_v33  ;;  %v2744_v35 = vpop.f32.mrb[26].mxu1 }
 0x238   :  { %1017 = vst.msk [vmem:[#allocation3 + $0x50] sm:$0xff] %vm1006_vm3, %v1000_v32  ;;  %v1001_v36 = vmax.f32 %v2712_v3, %v2744_v35  ;;  %v962_v37 = vpop.f32.mrb[27].mxu1  ;;  %v2993_v3 = vld [vmem:[%s3634_s3 + $0x8] sm:$0xff]  }
 0x239   :  { %v1029_v38 = vld [vmem:[#allocation3 + $0x30] ss:$2 sm:$0xff]  ;;  %v1045_v39 = vld [vmem:[#allocation3 + $0x31] ss:$2 sm:$0xff]  ;;  %1015 = vst.msk [vmem:[#allocation3 + $0x40] sm:$0xff] %vm1006_vm3, %v998_v34  ;;  %v999_v40 = vmax.f32 %v800_v4, %v962_v37 }
 0x23a   :  { %v1057_v41 = vmax.f32 %v1029_v38, %v1045_v39  ;;  %v1027_v42 = vld [vmem:[#allocation3 + $0x20] ss:$2 sm:$0xff]  ;;  %v1043_v43 = vld [vmem:[#allocation3 + $0x21] ss:$2 sm:$0xff]  ;;  %1018 = vst.msk [vmem:[#allocation3 + $0x58] sm:$0xff] %vm1006_vm3, %v1001_v36  ;;  %v2999_v34 = vld [vmem:[%s3634_s3 + $0x58] sm:$0xff]  }
 0x23b   :  { %v1056_v45 = vmax.f32 %v1027_v42, %v1043_v43  ;;  %1016 = vst.msk [vmem:[#allocation3 + $0x48] sm:$0xff] %vm1006_vm3, %v999_v40  ;;  %v1108_v44 = vld [vmem:[#allocation4 + $0x11] sm:$0xff] }
 0x23c   :  { %1082 = vst.msk [vmem:[#allocation4 + $0x31] sm:$0xff] %vm1006_vm3, %v1057_v41  ;;  %v1107_v46 = vld [vmem:[#allocation4 + $0x1] sm:$0xff]  ;;  %v1088_v17 = vld [vmem:[#allocation4 + $0x10] sm:$0xff] }
 0x23d   :  { %1081 = vst.msk [vmem:[#allocation4 + $0x21] sm:$0xff] %vm1006_vm3, %v1056_v45  ;;  %v2747_v47 = vpop.f32.mrb[28].mxu1  ;;  %v1115_v48 = vpack.c.bf16 %v1108_v44, %v1107_v46  ;;  %v1087_v16 = vld [vmem:[#allocation4] sm:$0xff]  ;;  %v1331_v32 = vld [vmem:[#allocation4 + $0x12] sm:$0xff] }
 0x23e   :  { %v1004_v50 = vmax.f32 %v3402_v5, %v2747_v47  ;;  %v975_v51 = vpop.f32.mrb[29].mxu1  ;;  %v1095_v20 = vpack.c.bf16 %v1088_v17, %v1087_v16  ;;  %v1330_v31 = vld [vmem:[#allocation4 + $0x2] sm:$0xff]  ;;  %v3006_v44 = vld [vmem:[%s3635_s6 + $0x30] sm:$0xff]   ;;  %v3007_v46 = vld [vmem:[%s3635_s6 + $0x38] sm:$0xff]  }
 0x23f   :  { %v1002_v52 = vmax.f32 %v3404_v6, %v975_v51  ;;  %v2748_v53 = vpop.f32.mrb[30].mxu1  ;;  %2757 = vmatprep.mubr.msk.bf16.mxu1 %vm1006_vm3, %v1115_v48  ;;  %v2994_v6 = vld [vmem:[%s3634_s3 + $0x10] sm:$0xff]   ;;  %v1338_v35 = vpack.c.bf16 %v1331_v32, %v1330_v31  ;;  %2809 = vmatprep.subr.bf16.mxu0 %v3006_v44  ;;  %v3008_v47 = vld [vmem:[%s3635_s6 + $0x40] sm:$0xff]   ;;  %v3011_v16 = vld [vmem:[%s3635_s6 + $0x58] sm:$0xff]  }
 0x240   :  { %1021 = vst.msk [vmem:[#allocation3 + $0x70] sm:$0xff] %vm1006_vm3, %v1004_v50  ;;  %v1005_v54 = vmax.f32 %v3406_v7, %v2748_v53  ;;  %v978_v55 = vpop.f32.mrb[31].mxu1  ;;  %2810 = vmatpush3.bf16.msra.mxu0 %v3006_v44  ;;  %v2390_v48 = vld [vmem:[%s3636_s4] ss:$0 sm:$0xff] }
 0x241   :  { %v1033_v56 = vld [vmem:[#allocation3 + $0x50] ss:$2 sm:$0xff]  ;;  %v1049_v57 = vld [vmem:[#allocation3 + $0x51] ss:$2 sm:$0xff]  ;;  %1019 = vst.msk [vmem:[#allocation3 + $0x60] sm:$0xff] %vm1006_vm3, %v1002_v52  ;;  %v1003_v58 = vmax.f32 %v3408_v8, %v978_v55  ;;  %2811 = vmatprep.subr.bf16.mxu0 %v3007_v46  ;;  %v3012_v17 = vld [vmem:[%s3635_s6 + $0x60] sm:$0xff]  }
 0x242   :  { %v1059_v59 = vmax.f32 %v1033_v56, %v1049_v57  ;;  %v1031_v60 = vld [vmem:[#allocation3 + $0x40] ss:$2 sm:$0xff]  ;;  %v1047_v61 = vld [vmem:[#allocation3 + $0x41] ss:$2 sm:$0xff]  ;;  %1022 = vst.msk [vmem:[#allocation3 + $0x78] sm:$0xff] %vm1006_vm3, %v1005_v54 }
 0x243   :  { %v1058_v62 = vmax.f32 %v1031_v60, %v1047_v61  ;;  %1020 = vst.msk [vmem:[#allocation3 + $0x68] sm:$0xff] %vm1006_vm3, %v1003_v58  ;;  %v1110_v63 = vld [vmem:[#allocation4 + $0x31] sm:$0xff] }
 0x244   :  { %1084 = vst.msk [vmem:[#allocation4 + $0x51] sm:$0xff] %vm1006_vm3, %v1059_v59  ;;  %v1109_v0 = vld [vmem:[#allocation4 + $0x21] sm:$0xff]  ;;  %v1090_v22 = vld [vmem:[#allocation4 + $0x30] sm:$0xff]  ;;  %2812 = vmatpush3.bf16.msra.mxu0 %v3007_v46 }
 0x245   :  { %1083 = vst.msk [vmem:[#allocation4 + $0x41] sm:$0xff] %vm1006_vm3, %v1058_v62  ;;  %v1116_v2 = vpack.c.bf16 %v1110_v63, %v1109_v0  ;;  %v1089_v21 = vld [vmem:[#allocation4 + $0x20] sm:$0xff]  ;;  %v1333_v37 = vld [vmem:[#allocation4 + $0x32] sm:$0xff]  ;;  %2821 = vmatprep.subr.bf16.mxu0 %v3008_v47 }
 0x246   :  { %v1096_v25 = vpack.c.bf16 %v1090_v22, %v1089_v21  ;;  %v1332_v36 = vld [vmem:[#allocation4 + $0x22] sm:$0xff] }
 0x247   :  { %2758 = vmatmul.mubr.msk.bf16.vlgmr.msra.gmra.mrb[32].mxu1 %vm1006_vm3, %v1116_v2  ;;  %v1339_v40 = vpack.c.bf16 %v1333_v37, %v1332_v36  ;;  %v3016_v21 = vld [vmem:[%s3637_s7 + $0x20] sm:$0xff]  }
 0x248   :  { %2766 = vmatpush3.bf16.msra.mxu1 %v3381_v49  ;;  %v2995_v49 = vld [vmem:[%s3634_s3 + $0x18] sm:$0xff]   ;;  %v3017_v22 = vld [vmem:[%s3637_s7] sm:$0xff]  }
 0x249   :  { %v1037_v4 = vld [vmem:[#allocation3 + $0x70] ss:$2 sm:$0xff]  ;;  %v1053_v5 = vld [vmem:[#allocation3 + $0x71] ss:$2 sm:$0xff]  ;;  %2767 = vmatprep.subr.bf16.mxu1 %v2993_v3 }
 0x24a   :  { %v1061_v7 = vmax.f32 %v1037_v4, %v1053_v5  ;;  %v1035_v8 = vld [vmem:[#allocation3 + $0x60] ss:$2 sm:$0xff]  ;;  %v1051_v9 = vld [vmem:[#allocation3 + $0x61] ss:$2 sm:$0xff] }
 0x24b   :  { %v1060_v10 = vmax.f32 %v1035_v8, %v1051_v9  ;;  %v1112_v11 = vld [vmem:[#allocation4 + $0x51] sm:$0xff]  ;;  %v3009_v4 = vld [vmem:[%s3635_s6 + $0x48] sm:$0xff]  }
 0x24c   :  { %1086 = vst.msk [vmem:[#allocation4 + $0x71] sm:$0xff] %vm1006_vm3, %v1061_v7  ;;  %v1111_v12 = vld [vmem:[#allocation4 + $0x41] sm:$0xff]  ;;  %2768 = vmatpush3.bf16.msra.mxu1 %v2993_v3  ;;  %v1092_v24 = vld [vmem:[#allocation4 + $0x50] sm:$0xff] }
 0x24d   :  { %1085 = vst.msk [vmem:[#allocation4 + $0x61] sm:$0xff] %vm1006_vm3, %v1060_v10  ;;  %v1117_v13 = vpack.c.bf16 %v1112_v11, %v1111_v12  ;;  %2769 = vmatprep.subr.bf16.mxu1 %v2994_v6  ;;  %v1091_v23 = vld [vmem:[#allocation4 + $0x40] sm:$0xff]  ;;  %v1335_v39 = vld [vmem:[#allocation4 + $0x52] sm:$0xff] }
 0x24e   :  { %v1097_v27 = vpack.c.bf16 %v1092_v24, %v1091_v23  ;;  %v1334_v38 = vld [vmem:[#allocation4 + $0x42] sm:$0xff]  ;;  %v3010_v12 = vld [vmem:[%s3635_s6 + $0x50] sm:$0xff]  }
 0x24f   :  { %2761 = vmatprep.mubr.msk.bf16.mxu1 %vm1006_vm3, %v1117_v13  ;;  %v1340_v41 = vpack.c.bf16 %v1335_v39, %v1334_v38  ;;  %v3018_v23 = vld [vmem:[%s3637_s7 + $0x28] sm:$0xff]  }
 0x250   :  { %2770 = vmatpush3.bf16.msra.mxu1 %v2994_v6  ;;  %v3019_v24 = vld [vmem:[%s3637_s7 + $0x8] sm:$0xff]  }
 0x251   :  { %2771 = vmatprep.subr.bf16.mxu1 %v2995_v49 }
 0x253   :  { %v1114_v15 = vld [vmem:[#allocation4 + $0x71] sm:$0xff] }
 0x254   :  { %v1113_v18 = vld [vmem:[#allocation4 + $0x61] sm:$0xff]  ;;  %2772 = vmatpush3.bf16.msra.mxu1 %v2995_v49  ;;  %v1094_v30 = vld [vmem:[#allocation4 + $0x70] sm:$0xff] }
 0x255   :  { %v1118_v19 = vpack.c.bf16 %v1114_v15, %v1113_v18  ;;  %2781 = vmatprep.subr.bf16.mxu1 %v2996_v14  ;;  %v1093_v29 = vld [vmem:[#allocation4 + $0x60] sm:$0xff]  ;;  %v1337_v43 = vld [vmem:[#allocation4 + $0x72] sm:$0xff]  ;;  %v3013_v18 = vld [vmem:[%s3635_s6 + $0x68] sm:$0xff]  }
 0x256   :  { %v1098_v33 = vpack.c.bf16 %v1094_v30, %v1093_v29  ;;  %v1336_v42 = vld [vmem:[#allocation4 + $0x62] sm:$0xff] }
 0x257   :  { %2762 = vmatmul.mubr.msk.bf16.gmra.mrb[36].mxu1 %vm1006_vm3, %v1118_v19  ;;  %v1341_v45 = vpack.c.bf16 %v1337_v43, %v1336_v42  ;;  %v3014_v19 = vld [vmem:[%s3635_s6 + $0x70] sm:$0xff]  }
 0x258   :  { %2773 = vmatprep.mubr.msk.bf16.mxu1 %vm1006_vm3, %v1095_v20  ;;  %v3015_v20 = vld [vmem:[%s3635_s6 + $0x78] sm:$0xff]  }
 0x25f   :  { %2774 = vmatmul.mubr.msk.bf16.vlgmr.msra.gmra.mrb[32].mxu1 %vm1006_vm3, %v1096_v25  ;;  %v3020_v25 = vld [vmem:[%s3637_s7 + $0x30] sm:$0xff]  }
 0x260   :  { %2777 = vmatprep.mubr.msk.bf16.mxu1 %vm1006_vm3, %v1097_v27  ;;  %2782 = vmatpush3.bf16.msra.mxu1 %v2996_v14  ;;  %v3022_v27 = vld [vmem:[%s3637_s7 + $0x38] sm:$0xff]  }
 0x261   :  { %2783 = vmatprep.subr.bf16.mxu1 %v2997_v26 }
 0x264   :  { %2784 = vmatpush3.bf16.msra.mxu1 %v2997_v26  ;;  %v3021_v26 = vld [vmem:[%s3637_s7 + $0x10] sm:$0xff]  }
 0x265   :  { %2785 = vmatprep.subr.bf16.mxu1 %v2998_v28 }
 0x267   :  { %2778 = vmatmul.mubr.msk.bf16.gmra.mrb[36].mxu1 %vm1006_vm3, %v1098_v33 }
 0x268   :  { %2786 = vmatpush3.bf16.msra.mxu1 %v2998_v28  ;;  %2789 = vmatprep.mubr.msk.bf16.mxu1 %vm1006_vm3, %v1338_v35  ;;  %v3023_v28 = vld [vmem:[%s3637_s7 + $0x18] sm:$0xff]  }
 0x269   :  { %2787 = vmatprep.subr.bf16.mxu1 %v2999_v34 }
 0x26c   :  { %2788 = vmatpush3.bf16.msra.mxu1 %v2999_v34 }
 0x26d   :  { %2845 = vmatprep.subr.bf16.mxu1 %v3038_v1 }
 0x26f   :  { %2790 = vmatmul.mubr.msk.bf16.vlgmr.msra.gmra.mrb[32].mxu1 %vm1006_vm3, %v1339_v40 }
 0x270   :  { %2793 = vmatprep.mubr.msk.bf16.mxu1 %vm1006_vm3, %v1340_v41  ;;  %2846 = vmatpush3.bf16.msra.mxu1 %v3016_v21 }
 0x271   :  { %2847 = vmatprep.subr.bf16.mxu1 %v3038_v1 }
 0x274   :  { %2848 = vmatpush3.bf16.msra.mxu1 %v3018_v23 }
 0x275   :  { %2849 = vmatprep.subr.bf16.mxu1 %v3038_v1 }
 0x277   :  { %2794 = vmatmul.mubr.msk.bf16.gmra.mrb[36].mxu1 %vm1006_vm3, %v1341_v45 }
 0x278   :  { %2853 = vmatprep.mubr.msk.bf16.mxu1 %vm3039_vm4, %v3038_v1  ;;  %2850 = vmatpush3.bf16.msra.mxu1 %v3020_v25  ;;  %v3031_v25 = vld [vmem:[%s3637_s7 + $0x78] sm:$0xff]  }
 0x279   :  { %2851 = vmatprep.subr.bf16.mxu1 %v3038_v1 }
 0x27c   :  { %2852 = vmatpush3.bf16.msra.mxu1 %v3022_v27 }
 0x27d   :  { %2869 = vmatprep.subr.bf16.mxu1 %v3038_v1 }
 0x342   :  { %v2791_v50 = vpop.f32.mrb[32].mxu1 }
 0x343   :  { %v1469_v51 = vadd.f32 %v2791_v50, %v2390_v48  ;;  %v1421_v52 = vpop.f32.mrb[33].mxu1 }
 0x344   :  { %v1467_v53 = vadd.f32 %v2390_v48, %v1421_v52  ;;  %v2792_v54 = vpop.f32.mrb[34].mxu1 }
 0x345   :  { %v1470_v55 = vadd.f32 %v2792_v54, %v2390_v48  ;;  %v1424_v56 = vpop.f32.mrb[35].mxu1  ;;  %v1477_v58 = vmax.f32 %v1469_v51, 0.0 }
 0x346   :  { %v1468_v57 = vadd.f32 %v2390_v48, %v1424_v56  ;;  %v1475_v60 = vmax.f32 %v1467_v53, 0.0 }
 0x347   :  { %v1478_v59 = vmax.f32 %v1470_v55, 0.0 }
 0x348   :  { %v1476_v61 = vmax.f32 %v1468_v57, 0.0 }
 0x349   :  { %v1484_v62 = vpack.c.bf16 %v1478_v59, %v1477_v58 }
 0x34a   :  { %v1483_v63 = vpack.c.bf16 %v1476_v61, %v1475_v60  ;;  %v2795_v0 = vpop.f32.mrb[36].mxu1 }
 0x34b   :  { %v1473_v2 = vadd.f32 %v2795_v0, %v2390_v48  ;;  %v1437_v3 = vpop.f32.mrb[37].mxu1 }
 0x34c   :  { %v1471_v5 = vadd.f32 %v2390_v48, %v1437_v3  ;;  %v2796_v6 = vpop.f32.mrb[38].mxu1  ;;  %2813 = vmatprep.mubr.bf16.mxu0 %v1483_v63 }
 0x34d   :  { %v1474_v7 = vadd.f32 %v2796_v6, %v2390_v48  ;;  %v1440_v8 = vpop.f32.mrb[39].mxu1  ;;  %2814 = vmatmul.mubr.bf16.vlgmr.msra.gmra.mrb[16].mxu0 %v1484_v62  ;;  %v1481_v10 = vmax.f32 %v1473_v2, 0.0 }
 0x34e   :  { %v1472_v9 = vadd.f32 %v2390_v48, %v1440_v8  ;;  %2822 = vmatpush3.bf16.msra.mxu0 %v3008_v47  ;;  %v1479_v13 = vmax.f32 %v1471_v5, 0.0  ;;  %v3024_v5 = vld [vmem:[%s3637_s7 + $0x40] sm:$0xff]  }
 0x34f   :  { %v1482_v11 = vmax.f32 %v1474_v7, 0.0  ;;  %2823 = vmatprep.subr.bf16.mxu0 %v3009_v4  ;;  %v3025_v7 = vld [vmem:[%s3637_s7 + $0x60] sm:$0xff]  }
 0x350   :  { %v1480_v49 = vmax.f32 %v1472_v9, 0.0  ;;  %v3026_v9 = vld [vmem:[%s3637_s7 + $0x48] sm:$0xff]  }
 0x351   :  { %v1486_v14 = vpack.c.bf16 %v1482_v11, %v1481_v10  ;;  %v3027_v10 = vld [vmem:[%s3637_s7 + $0x68] sm:$0xff]   ;;  %v3028_v11 = vld [vmem:[%s3637_s7 + $0x50] sm:$0xff]  }
 0x352   :  { %v1485_v15 = vpack.c.bf16 %v1480_v49, %v1479_v13  ;;  %2824 = vmatpush3.bf16.msra.mxu0 %v3009_v4  ;;  %v3029_v49 = vld [vmem:[%s3637_s7 + $0x70] sm:$0xff]  }
 0x353   :  { %2825 = vmatprep.subr.bf16.mxu0 %v3010_v12 }
 0x354   :  { %2817 = vmatprep.mubr.bf16.mxu0 %v1485_v15 }
 0x355   :  { %2818 = vmatmul.mubr.bf16.gmra.mrb[20].mxu0 %v1486_v14 }
 0x356   :  { %2826 = vmatpush3.bf16.msra.mxu0 %v3010_v12  ;;  %2837 = vmatprep.mubr.bf16.mxu0 %v1483_v63 }
 0x357   :  { %2827 = vmatprep.subr.bf16.mxu0 %v3011_v16 }
 0x35a   :  { %2828 = vmatpush3.bf16.msra.mxu0 %v3011_v16 }
 0x35b   :  { %2829 = vmatprep.subr.bf16.mxu0 %v3012_v17 }
 0x35e   :  { %2830 = vmatpush3.bf16.msra.mxu0 %v3012_v17 }
 0x35f   :  { %2831 = vmatprep.subr.bf16.mxu0 %v3013_v18 }
 0x362   :  { %2832 = vmatpush3.bf16.msra.mxu0 %v3013_v18 }
 0x363   :  { %2833 = vmatprep.subr.bf16.mxu0 %v3014_v19 }
 0x366   :  { %2834 = vmatpush3.bf16.msra.mxu0 %v3014_v19 }
 0x367   :  { %2835 = vmatprep.subr.bf16.mxu0 %v3015_v20 }
 0x36a   :  { %2836 = vmatpush3.bf16.msra.mxu0 %v3015_v20 }
 0x36b   :  { %2857 = vmatprep.subr.bf16.mxu0 %v3038_v1 }
 0x36d   :  { %2838 = vmatmul.mubr.bf16.vlgmr.msra.gmra.mrb[24].mxu0 %v1484_v62 }
 0x36e   :  { %2841 = vmatprep.mubr.bf16.mxu0 %v1485_v15  ;;  %2858 = vmatpush3.bf16.msra.mxu0 %v3017_v22 }
 0x36f   :  { %2859 = vmatprep.subr.bf16.mxu0 %v3038_v1 }
 0x372   :  { %2860 = vmatpush3.bf16.msra.mxu0 %v3019_v24  ;;  %v3030_v24 = vld [vmem:[%s3637_s7 + $0x58] sm:$0xff]  }
 0x373   :  { %2861 = vmatprep.subr.bf16.mxu0 %v3038_v1 }
 0x375   :  { %2842 = vmatmul.mubr.bf16.gmra.mrb[28].mxu0 %v1486_v14 }
 0x376   :  { %2865 = vmatprep.mubr.msk.bf16.mxu0 %vm3039_vm4, %v3038_v1  ;;  %2862 = vmatpush3.bf16.msra.mxu0 %v3021_v26 }
 0x377   :  { %2863 = vmatprep.subr.bf16.mxu0 %v3038_v1 }
 0x37a   :  { %2864 = vmatpush3.bf16.msra.mxu0 %v3023_v28 }
 0x37b   :  { %2881 = vmatprep.subr.bf16.mxu0 %v3038_v1 }
 0x420   :  { %v2815_v29 = vpop.f32.mrb[16].mxu0 }
 0x421   :  { %v1585_v30 = vpop.f32.mrb[17].mxu0 }
 0x422   :  { %v2816_v31 = vpop.f32.mrb[18].mxu0 }
 0x423   :  { %v1588_v32 = vpop.f32.mrb[19].mxu0 }
 0x428   :  { %v2819_v33 = vpop.f32.mrb[20].mxu0 }
 0x429   :  { %v1601_v34 = vpop.f32.mrb[21].mxu0 }
 0x42a   :  { %v2820_v35 = vpop.f32.mrb[22].mxu0 }
 0x42b   :  { %v1604_v36 = vpop.f32.mrb[23].mxu0 }
 0x440   :  { %v2839_v37 = vpop.f32.mrb[24].mxu0 }
 0x441   :  { %v1748_v38 = vmax.f32 %v2815_v29, %v2839_v37  ;;  %v1715_v39 = vpop.f32.mrb[25].mxu0 }
 0x442   :  { %v1746_v40 = vmax.f32 %v1585_v30, %v1715_v39  ;;  %v2840_v41 = vpop.f32.mrb[26].mxu0  ;;  %v3032_v30 = vld [vmem:[%s3638_s9] sm:$0xff]  }
 0x443   :  { %1756 = vst.msk [vmem:[#allocation5 + $0x10] sm:$0xff] %vm1006_vm3, %v1748_v38  ;;  %v1749_v42 = vmax.f32 %v2816_v31, %v2840_v41  ;;  %v1718_v43 = vpop.f32.mrb[27].mxu0  ;;  %v3033_v31 = vld [vmem:[%s3638_s9 + $0x8] sm:$0xff]  }
 0x444   :  { %1754 = vst.msk [vmem:[#allocation5] sm:$0xff] %vm1006_vm3, %v1746_v40  ;;  %v1747_v45 = vmax.f32 %v1588_v32, %v1718_v43  ;;  %v3034_v32 = vld [vmem:[%s3638_s9 + $0x10] sm:$0xff]  }
 0x445   :  { %1757 = vst.msk [vmem:[#allocation5 + $0x18] sm:$0xff] %vm1006_vm3, %v1749_v42 }
 0x446   :  { %1755 = vst.msk [vmem:[#allocation5 + $0x8] sm:$0xff] %vm1006_vm3, %v1747_v45 }
 0x448   :  { %v2843_v44 = vpop.f32.mrb[28].mxu0 }
 0x449   :  { %v1752_v46 = vmax.f32 %v2819_v33, %v2843_v44  ;;  %v1731_v47 = vpop.f32.mrb[29].mxu0  ;;  %v3035_v33 = vld [vmem:[%s3638_s9 + $0x18] sm:$0xff]  }
 0x44a   :  { %v1750_v48 = vmax.f32 %v1601_v34, %v1731_v47  ;;  %v2844_v50 = vpop.f32.mrb[30].mxu0  ;;  %v2467_v47 = vld [vmem:[%s3639_s8] ss:$0 sm:$0xff] }
 0x44b   :  { %1760 = vst.msk [vmem:[#allocation5 + $0x30] sm:$0xff] %vm1006_vm3, %v1752_v46  ;;  %v1753_v51 = vmax.f32 %v2820_v35, %v2844_v50  ;;  %v1734_v52 = vpop.f32.mrb[31].mxu0 }
 0x44c   :  { %1758 = vst.msk [vmem:[#allocation5 + $0x20] sm:$0xff] %vm1006_vm3, %v1750_v48  ;;  %v1751_v53 = vmax.f32 %v1604_v36, %v1734_v52 }
 0x44d   :  { %1761 = vst.msk [vmem:[#allocation5 + $0x38] sm:$0xff] %vm1006_vm3, %v1753_v51  ;;  %v1780_v54 = vld [vmem:[#allocation5 + $0x2] ss:$8 sm:$0xf] }
 0x44e   :  { %1759 = vst.msk [vmem:[#allocation5 + $0x28] sm:$0xff] %vm1006_vm3, %v1751_v53  ;;  %v1784_v55 = vld [vmem:[#allocation5 + $0x3] ss:$8 sm:$0xf] }
 0x44f   :  { %v1762_v56 = vld [vmem:[#allocation5] ss:$8 sm:$0xf]  ;;  %v1766_v57 = vld [vmem:[#allocation5 + $0x1] ss:$8 sm:$0xf] }
 0x450   :  { %v1933_v16 = vld [vmem:[#allocation5 + $0x4] ss:$8 sm:$0xf]  ;;  %v1937_v17 = vld [vmem:[#allocation5 + $0x5] ss:$8 sm:$0xf] }
 0x451   :  { %v2020_v20 = vld [vmem:[#allocation5 + $0x6] ss:$8 sm:$0xf]  ;;  %v2024_v21 = vld [vmem:[#allocation5 + $0x7] ss:$8 sm:$0xf] }
 0x455   :  { %v1781_v58 = vld [vmem:[#allocation5 + $0x2] ss:$8 sm:$0xf0]  ;;  %v1785_v59 = vld [vmem:[#allocation5 + $0x3] ss:$8 sm:$0xf0] }
 0x456   :  { %v1782_v60 = vor.u32 %v1781_v58, %v1780_v54  ;;  %v1786_v61 = vor.u32 %v1785_v59, %v1784_v55  ;;  %v1763_v62 = vld [vmem:[#allocation5] ss:$8 sm:$0xf0]  ;;  %v1767_v63 = vld [vmem:[#allocation5 + $0x1] ss:$8 sm:$0xf0] }
 0x457   :  { %v1764_v0 = vor.u32 %v1763_v62, %v1762_v56  ;;  %v1768_v2 = vor.u32 %v1767_v63, %v1766_v57  ;;  %v1934_v12 = vld [vmem:[#allocation5 + $0x4] ss:$8 sm:$0xf0]  ;;  %v1938_v13 = vld [vmem:[#allocation5 + $0x5] ss:$8 sm:$0xf0] }
 0x458   :  { %v1787_v3 = vmax.f32 %v1782_v60, %v1786_v61  ;;  %v2021_v14 = vld [vmem:[#allocation5 + $0x6] ss:$8 sm:$0xf0]  ;;  %v2025_v15 = vld [vmem:[#allocation5 + $0x7] ss:$8 sm:$0xf0]  ;;  %v1935_v18 = vor.u32 %v1934_v12, %v1933_v16  ;;  %v1939_v19 = vor.u32 %v1938_v13, %v1937_v17 }
 0x459   :  { %v1769_v4 = vmax.f32 %v1764_v0, %v1768_v2  ;;  %v2022_v22 = vor.u32 %v2021_v14, %v2020_v20  ;;  %v2026_v23 = vor.u32 %v2025_v15, %v2024_v21  ;;  %v3036_v58 = vld [vmem:[%s3640_s11] sm:$0xff]   ;;  %v3037_v59 = vld [vmem:[%s3640_s11 + $0x8] sm:$0xff]  }
 0x45a   :  { %v1788_v6 = vpack.c.bf16 %v1787_v3, %v1787_v3  ;;  %v1940_v26 = vmax.f32 %v1935_v18, %v1939_v19  ;;  %v2468_v60 = vld [vmem:[%s3641_s10] ss:$0 sm:$0xff] }
 0x45b   :  { %v1770_v8 = vpack.c.bf16 %v1769_v4, %v1769_v4  ;;  %v2027_v27 = vmax.f32 %v2022_v22, %v2026_v23 }
 0x45c   :  { %2854 = vmatmul.mubr.msk.bf16.vlgmr.msra.gmra.mrb[40].mxu1 %vm1006_vm3, %v1788_v6  ;;  %v1941_v28 = vpack.c.bf16 %v1940_v26, %v1940_v26 }
 0x45d   :  { %2866 = vmatmul.mubr.msk.bf16.vlgmr.msra.gmra.mrb[32].mxu0 %vm1006_vm3, %v1770_v8  ;;  %2870 = vmatpush3.bf16.msra.mxu1 %v3024_v5  ;;  %v2028_v29 = vpack.c.bf16 %v2027_v27, %v2027_v27 }
 0x45e   :  { %2882 = vmatpush3.bf16.msra.mxu0 %v3025_v7  ;;  %2871 = vmatprep.subr.bf16.mxu1 %v3038_v1 }
 0x45f   :  { %2883 = vmatprep.subr.bf16.mxu0 %v3038_v1  ;;  %2877 = vmatprep.mubr.msk.bf16.mxu1 %vm3039_vm4, %v3038_v1 }
 0x460   :  { %2889 = vmatprep.mubr.msk.bf16.mxu0 %vm3039_vm4, %v3038_v1 }
 0x461   :  { %2872 = vmatpush3.bf16.msra.mxu1 %v3026_v9 }
 0x462   :  { %2884 = vmatpush3.bf16.msra.mxu0 %v3027_v10  ;;  %2873 = vmatprep.subr.bf16.mxu1 %v3038_v1 }
 0x463   :  { %2885 = vmatprep.subr.bf16.mxu0 %v3038_v1 }
 0x465   :  { %2874 = vmatpush3.bf16.msra.mxu1 %v3028_v11 }
 0x466   :  { %2886 = vmatpush3.bf16.msra.mxu0 %v3029_v49  ;;  %2875 = vmatprep.subr.bf16.mxu1 %v3038_v1 }
 0x467   :  { %2887 = vmatprep.subr.bf16.mxu0 %v3038_v1 }
 0x469   :  { %2876 = vmatpush3.bf16.msra.mxu1 %v3030_v24 }
 0x46a   :  { %2888 = vmatpush3.bf16.msra.mxu0 %v3031_v25  ;;  %2893 = vmatprep.subr.bf16.mxu1 %v3038_v1 }
 0x46b   :  { %2905 = vmatprep.subr.bf16.mxu0 %v3038_v1 }
 0x46c   :  { %2878 = vmatmul.mubr.msk.bf16.vlgmr.msra.gmra.mrb[44].mxu1 %vm1006_vm3, %v1941_v28 }
 0x46d   :  { %2890 = vmatmul.mubr.msk.bf16.vlgmr.msra.gmra.mrb[36].mxu0 %vm1006_vm3, %v2028_v29  ;;  %2901 = vmatprep.mubr.msk.bf16.mxu1 %vm3039_vm4, %v3038_v1 }
 0x46e   :  { %2909 = vmatprep.mubr.msk.bf16.mxu0 %vm3039_vm4, %v3038_v1  ;;  %2894 = vmatpush3.bf16.msra.mxu1 %v3032_v30 }
 0x46f   :  { %2895 = vmatprep.subr.bf16.mxu1 %v3038_v1  ;;  %2906 = vmatpush3.bf16.msra.mxu0 %v3036_v58 }
 0x470   :  { %2907 = vmatprep.subr.bf16.mxu0 %v3038_v1 }
 0x472   :  { %2896 = vmatpush3.bf16.msra.mxu1 %v3033_v31 }
 0x473   :  { %2897 = vmatprep.subr.bf16.mxu1 %v3038_v1  ;;  %2908 = vmatpush3.bf16.msra.mxu0 %v3037_v59 }
 0x476   :  { %2898 = vmatpush3.bf16.msra.mxu1 %v3034_v32 }
 0x477   :  { %2899 = vmatprep.subr.bf16.mxu1 %v3038_v1  ;;  %v2474_v1 = vld [vmem:[%s3642_s12] ss:$0 sm:$0xff] }
 0x47a   :  { %2900 = vmatpush3.bf16.msra.mxu1 %v3035_v33 }
 0x52f   :  { %v1859_v34 = vpop.f32.mrb[40].mxu1 }
 0x530   :  { %v1926_v35 = vpop.f32.mrb[32].mxu0  ;;  %v2855_v36 = vpop.f32.mrb[41].mxu1 }
 0x531   :  { %v1927_v37 = vadd.f32 %v1926_v35, %v1859_v34  ;;  %v2867_v38 = vpop.f32.mrb[33].mxu0  ;;  %v1862_v39 = vpop.f32.mrb[42].mxu1 }
 0x532   :  { %v1929_v40 = vpop.f32.mrb[34].mxu0  ;;  %v2856_v41 = vpop.f32.mrb[43].mxu1 }
 0x533   :  { %v2868_v42 = vpop.f32.mrb[35].mxu0 }
 0x53f   :  { %v2012_v43 = vpop.f32.mrb[44].mxu1 }
 0x540   :  { %v2018_v45 = vadd.f32 %v2012_v43, %v1927_v37  ;;  %v2099_v44 = vpop.f32.mrb[36].mxu0  ;;  %v2879_v46 = vpop.f32.mrb[45].mxu1 }
 0x541   :  { %v2891_v48 = vpop.f32.mrb[37].mxu0  ;;  %v2015_v50 = vpop.f32.mrb[46].mxu1 }
 0x542   :  { %v2105_v51 = vadd.f32 %v2099_v44, %v2018_v45  ;;  %v2102_v52 = vpop.f32.mrb[38].mxu0  ;;  %v2880_v53 = vpop.f32.mrb[47].mxu1 }
 0x543   :  { %v2892_v54 = vpop.f32.mrb[39].mxu0 }
 0x544   :  { %v2113_v55 = vadd.f32 %v2467_v47, %v2105_v51 }
 0x546   :  { %v2114_v56 = vmax.f32 %v2113_v55, 0.0 }
 0x548   :  { %v2115_v57 = vpack.c.bf16 %v2114_v56, %v2114_v56 }
 0x54a   :  { %2902 = vmatmul.mubr.msk.bf16.vlgmr.msra.gmra.mrb[48].mxu1 %vm1006_vm3, %v2115_v57 }
 0x61d   :  { %v2192_v61 = vpop.f32.mrb[48].mxu1 }
 0x61e   :  { %v2193_v62 = vadd.f32 %v2468_v60, %v2192_v61  ;;  %v2903_v63 = vpop.f32.mrb[49].mxu1 }
 0x61f   :  { %v2195_v0 = vpop.f32.mrb[50].mxu1 }
 0x620   :  { %v2198_v2 = vmax.f32 %v2193_v62, 0.0  ;;  %v2904_v3 = vpop.f32.mrb[51].mxu1 }
 0x622   :  { %v2199_v4 = vpack.c.bf16 %v2198_v2, %v2198_v2 }
 0x624   :  { %2910 = vmatmul.mubr.msk.bf16.vlgmr.msra.gmra.mrb[40].mxu0 %vm2223_vm5, %v2199_v4 }
 0x6f7   :  { %v2261_v5 = vpop.f32.mrb[40].mxu0 }
 0x6f8   :  { %v2262_v6 = vadd.f32 %v2474_v1, %v2261_v5  ;;  %v2911_v7 = vpop.f32.mrb[41].mxu0 }
 0x6f9   :  { %v2264_v8 = vpop.f32.mrb[42].mxu0 }
 0x6fa   :  { %2267 = vst [vmem:[%s3643_s13] sm:$0xff] %v2262_v6  ;;  %v2912_v9 = vpop.f32.mrb[43].mxu0 }

</bundles_post_ra>
